<compile_context>
chip_gen: v5e
topology: v5e:2x2
jax: 0.10.0
libtpu: 0.0.40
codegen_flags: <defaults>
</compile_context>

<pallas_src>
import jax
import jax.numpy as jnp
from jax.experimental import pallas as pl
from jax.experimental.pallas import tpu as pltpu

# ----------------------------- model config ---------------------------------
VOCAB = 128
HIDDEN = 32
N_HEADS = 4
N_KV_HEADS = 2
HEAD_DIM = HIDDEN // N_HEADS          # 8
Q_SIZE = N_HEADS * HEAD_DIM           # 32
KV_SIZE = N_KV_HEADS * HEAD_DIM       # 16
INTER = 64
N_EXPERTS = 4
TOP_K = 2
N_LAYERS = 2
SEQ = 8
RMS_EPS = 1e-5
ROPE_THETA = 10000.0
EI = N_EXPERTS * INTER                # 256 (lane-dense: 2 x 128)
ATT_FUSED = 2 * Q_SIZE + 3 * KV_SIZE  # 112 = |q|+|q_rot|+|k|+|k_rot|+|v|
ATT_PAD = 128                         # pad fused qkv width to full lane width


# ----------------------------- fused model kernel ---------------------------
def _mixtral_kernel(embed_ref, cos_ref, sin_ref, expand_ref, fnorm_ref,
                    ln1_ref, watt_ref, wo_ref, ln2_ref, wgate_ref,
                    w13_ref, w2_ref, out_ref):
    T = SEQ

    def rmsnorm(x, w):
        var = jnp.mean(x * x, axis=-1, keepdims=True)
        return x * jax.lax.rsqrt(var + RMS_EPS) * w

    # ---- loop-invariant constants (built once for the whole stack) ----
    cos_q = cos_ref[...]                       # (T, Q_SIZE)
    sin_q = sin_ref[...]
    cos_k = cos_q[:, :KV_SIZE]                 # table is head-dim periodic
    sin_k = sin_q[:, :KV_SIZE]
    expand = expand_ref[...]                   # (E, E*I) 0/1 expansion

    row = jax.lax.broadcasted_iota(jnp.int32, (T, T), 0)
    col = jax.lax.broadcasted_iota(jnp.int32, (T, T), 1)
    causal = row >= col
    e_iota = jax.lax.broadcasted_iota(
        jnp.int32, (T, N_EXPERTS), 1).astype(jnp.float32)

    scale = HEAD_DIM ** -0.5
    group = N_HEADS // N_KV_HEADS

    hidden = embed_ref[...]                    # (T, H) f32
    residual = jnp.zeros_like(hidden)

    for layer in range(N_LAYERS):              # static unroll (2 layers)
        ln1 = ln1_ref[layer]                   # (1, H)   f32
        watt = watt_ref[layer]                 # (H, 128) bf16  [Wq|WqPq|Wk|WkPk|Wv]
        wo = wo_ref[layer]                     # (Q, H)   bf16
        ln2 = ln2_ref[layer]                   # (1, H)   f32
        wgate = wgate_ref[layer]               # (H, E)   f32
        w13 = w13_ref[layer]                   # (H, 2EI) bf16  [W1|W3]
        w2 = w2_ref[layer]                     # (EI, H)  bf16

        # ----------------- attention block -----------------
        res1 = hidden + residual
        x1 = rmsnorm(res1, ln1)                # (T, H) f32

        # single fused projection: qkv base + pre-rotated components
        qkv = jnp.dot(x1.astype(jnp.bfloat16), watt,
                      preferred_element_type=jnp.float32)        # (T, 128)
        q = qkv[:, 0:Q_SIZE] * cos_q + qkv[:, Q_SIZE:2 * Q_SIZE] * sin_q
        k = (qkv[:, 2 * Q_SIZE:2 * Q_SIZE + KV_SIZE] * cos_k
             + qkv[:, 2 * Q_SIZE + KV_SIZE:2 * Q_SIZE + 2 * KV_SIZE] * sin_k)
        v = qkv[:, 2 * Q_SIZE + 2 * KV_SIZE:ATT_FUSED]           # (T, KV)
        v_bf = v.astype(jnp.bfloat16)

        # per-head attention; output projection accumulated with sublane-
        # aligned row slices of Wo (no lane-shuffling concatenate).
        attn_out = jnp.zeros((T, HIDDEN), jnp.float32)
        for h in range(N_HEADS):               # static unroll (4 heads)
            kvh = h // group
            qh = q[:, h * HEAD_DIM:(h + 1) * HEAD_DIM]           # (T, D) f32
            kh = k[:, kvh * HEAD_DIM:(kvh + 1) * HEAD_DIM]
            vh = v_bf[:, kvh * HEAD_DIM:(kvh + 1) * HEAD_DIM]
            s = jnp.dot(qh, kh.T, preferred_element_type=jnp.float32) * scale
            s = jnp.where(causal, s, -1e30)
            s = s - jnp.max(s, axis=-1, keepdims=True)
            p = jnp.exp(s)
            p = p / jnp.sum(p, axis=-1, keepdims=True)
            hout = jnp.dot(p.astype(jnp.bfloat16), vh,
                           preferred_element_type=jnp.float32)   # (T, D)
            attn_out = attn_out + jnp.dot(
                hout.astype(jnp.bfloat16),
                wo[h * HEAD_DIM:(h + 1) * HEAD_DIM, :],
                preferred_element_type=jnp.float32)              # (T, H)

        # ----------------- MoE block -----------------
        res2 = attn_out + res1
        x2 = rmsnorm(res2, ln2)
        x2b = x2.astype(jnp.bfloat16)

        # router (f32): softmax over top-2 logits == renormalised top-2 softmax
        logits = jnp.dot(x2, wgate, preferred_element_type=jnp.float32)  # (T, E)
        m1 = jnp.max(logits, axis=-1, keepdims=True)
        idx1 = jnp.min(jnp.where(logits == m1, e_iota, float(N_EXPERTS)),
                       axis=-1, keepdims=True)
        mask1 = e_iota == idx1
        logits_rest = jnp.where(mask1, -1e30, logits)
        m2 = jnp.max(logits_rest, axis=-1, keepdims=True)
        idx2 = jnp.min(jnp.where(logits_rest == m2, e_iota, float(N_EXPERTS)),
                       axis=-1, keepdims=True)
        mask2 = e_iota == idx2
        selected = jnp.logical_or(mask1, mask2)
        pe = jnp.where(selected, jnp.exp(logits - m1), 0.0)
        rw = pe / jnp.sum(pe, axis=-1, keepdims=True)            # (T, E)

        # experts stacked lane-dense; W1/W3 fused -> one (T, 512) matmul
        gu = jnp.dot(x2b, w13, preferred_element_type=jnp.float32)
        g = gu[:, :EI]
        u = gu[:, EI:]
        act = (g * jax.nn.sigmoid(g)) * u                        # SwiGLU
        rw_wide = jnp.dot(rw, expand,
                          preferred_element_type=jnp.float32)    # (T, E*I)
        moe_out = jnp.dot((act * rw_wide).astype(jnp.bfloat16), w2,
                          preferred_element_type=jnp.float32)    # (T, H)

        hidden = moe_out
        residual = res2

    out_ref[...] = rmsnorm(hidden + residual, fnorm_ref[...])


# ----------------------------- host-side helpers -----------------------------
def _rope_tables(positions):
    """cos/sin tables tiled across heads, shape (T, Q_SIZE)."""
    half = HEAD_DIM // 2
    inv_freq = 1.0 / (ROPE_THETA **
                      (jnp.arange(half, dtype=jnp.float32) / half))
    freqs = positions.astype(jnp.float32)[:, None] * inv_freq[None, :]
    cos = jnp.cos(freqs)
    sin = jnp.sin(freqs)
    cos_d = jnp.concatenate([cos, cos], axis=-1)     # (T, D) neox layout
    sin_d = jnp.concatenate([sin, sin], axis=-1)
    return jnp.tile(cos_d, (1, N_HEADS)), jnp.tile(sin_d, (1, N_HEADS))


def _rot_half_matrix(width, d):
    """Signed permutation P s.t. x @ P == per-head rotate_half(x) (neox)."""
    half = d // 2
    r = jnp.arange(width)[:, None]
    c = jnp.arange(width)[None, :]
    same = (r // d) == (c // d)
    rl = r % d
    cl = c % d
    neg = same & (cl < half) & (rl == cl + half)
    pos = same & (cl >= half) & (rl == cl - half)
    return jnp.where(neg, -1.0, jnp.where(pos, 1.0, 0.0)).astype(jnp.float32)


def _expert_expand_matrix():
    """(E, E*I) matrix mapping per-expert routing weight to its I columns."""
    e = jnp.arange(N_EXPERTS)[:, None]
    c = jnp.arange(EI)[None, :]
    return (c // INTER == e).astype(jnp.float32)


def _full_spec(shape):
    n = len(shape)
    return pl.BlockSpec(tuple(shape), lambda i, n=n: (0,) * n)


def mixtral_forward(params, input_ids, positions):
    hidden = jnp.take(params["embed_tokens"], input_ids, axis=0)  # (T, H)
    cos_q, sin_q = _rope_tables(positions)
    T = hidden.shape[0]

    return pl.pallas_call(
        _mixtral_kernel,
        out_shape=jax.ShapeDtypeStruct((T, HIDDEN), jnp.float32),
        grid=(1,),
        in_specs=[
            _full_spec((T, HIDDEN)),                   # embeddings
            _full_spec((T, Q_SIZE)),                   # cos
            _full_spec((T, Q_SIZE)),                   # sin
            _full_spec((N_EXPERTS, EI)),               # expert->lane expansion
            _full_spec((1, HIDDEN)),                   # final norm weight
            _full_spec((N_LAYERS, 1, HIDDEN)),         # input_layernorm
            _full_spec((N_LAYERS, HIDDEN, ATT_PAD)),   # fused [Wq|WqPq|Wk|WkPk|Wv]
            _full_spec((N_LAYERS, Q_SIZE, HIDDEN)),    # Wo
            _full_spec((N_LAYERS, 1, HIDDEN)),         # post_attention_layernorm
            _full_spec((N_LAYERS, HIDDEN, N_EXPERTS)), # router gate
            _full_spec((N_LAYERS, HIDDEN, 2 * EI)),    # fused [W1|W3] stacked
            _full_spec((N_LAYERS, EI, HIDDEN)),        # W2 stacked
        ],
        out_specs=_full_spec((T, HIDDEN)),
        compiler_params=pltpu.CompilerParams(
            dimension_semantics=("arbitrary",)),
    )(hidden, cos_q, sin_q, params["expand"], params["norm"],
      params["ln1"], params["watt"], params["wo"], params["ln2"],
      params["wgate"], params["w13"], params["w2s"])


# ----------------------------- parameter init --------------------------------
def init_params(key):
    def nrm(k, shape, scale=0.05):
        return jax.random.normal(k, shape, jnp.float32) * scale

    keys = jax.random.split(key, 2 + N_LAYERS)
    pq = _rot_half_matrix(Q_SIZE, HEAD_DIM)          # (32, 32)
    pk = _rot_half_matrix(KV_SIZE, HEAD_DIM)         # (16, 16)

    params = {
        "embed_tokens": nrm(keys[0], (VOCAB, HIDDEN), 0.1),
        "norm": jnp.ones((1, HIDDEN), jnp.float32),
        "expand": _expert_expand_matrix(),
    }

    ln1, ln2, watt, wo, wgate, w13, w2s = ([] for _ in range(7))
    for li in range(N_LAYERS):
        lk = jax.random.split(keys[2 + li], 6)
        # torch layouts, pre-transposed once here to (In, Out)
        qkv_t = nrm(lk[0], (Q_SIZE + 2 * KV_SIZE, HIDDEN)).T      # (H, Q+2KV)
        wq = qkv_t[:, :Q_SIZE]
        wk = qkv_t[:, Q_SIZE:Q_SIZE + KV_SIZE]
        wv = qkv_t[:, Q_SIZE + KV_SIZE:]
        # fuse RoPE rotate-half into the projection weights:
        #   q = (x@Wq)*cos + (x@Wq@Pq)*sin  and likewise for k.
        fused = jnp.concatenate(
            [wq, wq @ pq, wk, wk @ pk, wv], axis=1)               # (H, 112)
        fused = jnp.pad(fused, ((0, 0), (0, ATT_PAD - ATT_FUSED)))
        watt.append(fused.astype(jnp.bfloat16))

        wo.append(nrm(lk[1], (HIDDEN, Q_SIZE)).T.astype(jnp.bfloat16))  # (Q, H)
        wgate.append(nrm(lk[2], (N_EXPERTS, HIDDEN)).T)                 # (H, E) f32

        w1 = nrm(lk[3], (N_EXPERTS, INTER, HIDDEN))               # gate_proj
        w3 = nrm(lk[4], (N_EXPERTS, INTER, HIDDEN))               # up_proj
        w2 = nrm(lk[5], (N_EXPERTS, HIDDEN, INTER))               # down_proj
        # stack experts along output/input dims (lane-dense E*I = 256),
        # then fuse W1|W3 along lanes (512 wide, split at 128-aligned 256).
        w1s = jnp.transpose(w1, (2, 0, 1)).reshape(HIDDEN, EI)
        w3s = jnp.transpose(w3, (2, 0, 1)).reshape(HIDDEN, EI)
        w13.append(jnp.concatenate([w1s, w3s], axis=1).astype(jnp.bfloat16))
        w2s.append(jnp.transpose(w2, (0, 2, 1)).reshape(EI, HIDDEN)
                   .astype(jnp.bfloat16))
        ln1.append(jnp.ones((1, HIDDEN), jnp.float32))
        ln2.append(jnp.ones((1, HIDDEN), jnp.float32))

    params.update({
        "ln1": jnp.stack(ln1),        # (L, 1, H)        f32
        "watt": jnp.stack(watt),      # (L, H, 128)      bf16
        "wo": jnp.stack(wo),          # (L, Q, H)        bf16
        "ln2": jnp.stack(ln2),        # (L, 1, H)        f32
        "wgate": jnp.stack(wgate),    # (L, H, E)        f32
        "w13": jnp.stack(w13),        # (L, H, 2*E*I)    bf16
        "w2s": jnp.stack(w2s),        # (L, E*I, H)      bf16
    })
    return params


# ----------------------------- main -------------------------------------------
if __name__ == "__main__":
    key = jax.random.PRNGKey(0)
    pkey, ikey = jax.random.split(key)
    params = init_params(pkey)

    input_ids = jax.random.randint(ikey, (SEQ,), 0, VOCAB, dtype=jnp.int32)
    positions = jnp.arange(SEQ, dtype=jnp.int32)

    out = jax.jit(mixtral_forward)(params, input_ids, positions)
    out = jax.block_until_ready(out)

    assert out.shape == (SEQ, HIDDEN)
    assert bool(jnp.all(jnp.isfinite(out)))
    print("KERNEL_OK")
</pallas_src>

<mosaic_0001>
module attributes {stable_mosaic.version = 11 : i64} {
  func.func @_mixtral_kernel(%arg0: i32, %arg1: memref<8x32xf32, #tpu.memory_space<vmem>>, %arg2: memref<8x32xf32, #tpu.memory_space<vmem>>, %arg3: memref<8x32xf32, #tpu.memory_space<vmem>>, %arg4: memref<4x256xf32, #tpu.memory_space<vmem>>, %arg5: memref<1x32xf32, #tpu.memory_space<vmem>>, %arg6: memref<2x1x32xf32, #tpu.memory_space<vmem>>, %arg7: memref<2x32x128xbf16, #tpu.memory_space<vmem>>, %arg8: memref<2x32x32xbf16, #tpu.memory_space<vmem>>, %arg9: memref<2x1x32xf32, #tpu.memory_space<vmem>>, %arg10: memref<2x32x4xf32, #tpu.memory_space<vmem>>, %arg11: memref<2x32x512xbf16, #tpu.memory_space<vmem>>, %arg12: memref<2x256x32xbf16, #tpu.memory_space<vmem>>, %arg13: memref<8x32xf32, #tpu.memory_space<vmem>>) attributes {dimension_semantics = [#tpu.dimension_semantics<arbitrary>], iteration_bounds = array<i64: 1>, scalar_prefetch = 0 : i64, scratch_operands = 0 : i64, tpu.core_type = #tpu.core_type<tc>, window_params = [{pipeline_mode = #tpu.pipeline_mode<synchronous>, transform_indices = @transform_0, window_bounds = array<i64: 8, 32>}, {pipeline_mode = #tpu.pipeline_mode<synchronous>, transform_indices = @transform_1, window_bounds = array<i64: 8, 32>}, {pipeline_mode = #tpu.pipeline_mode<synchronous>, transform_indices = @transform_2, window_bounds = array<i64: 8, 32>}, {pipeline_mode = #tpu.pipeline_mode<synchronous>, transform_indices = @transform_3, window_bounds = array<i64: 4, 256>}, {pipeline_mode = #tpu.pipeline_mode<synchronous>, transform_indices = @transform_4, window_bounds = array<i64: 1, 32>}, {pipeline_mode = #tpu.pipeline_mode<synchronous>, transform_indices = @transform_5, window_bounds = array<i64: 2, 1, 32>}, {pipeline_mode = #tpu.pipeline_mode<synchronous>, transform_indices = @transform_6, window_bounds = array<i64: 2, 32, 128>}, {pipeline_mode = #tpu.pipeline_mode<synchronous>, transform_indices = @transform_7, window_bounds = array<i64: 2, 32, 32>}, {pipeline_mode = #tpu.pipeline_mode<synchronous>, transform_indices = @transform_8, window_bounds = array<i64: 2, 1, 32>}, {pipeline_mode = #tpu.pipeline_mode<synchronous>, transform_indices = @transform_9, window_bounds = array<i64: 2, 32, 4>}, {pipeline_mode = #tpu.pipeline_mode<synchronous>, transform_indices = @transform_10, window_bounds = array<i64: 2, 32, 512>}, {pipeline_mode = #tpu.pipeline_mode<synchronous>, transform_indices = @transform_11, window_bounds = array<i64: 2, 256, 32>}, {pipeline_mode = #tpu.pipeline_mode<synchronous>, transform_indices = @transform_12, window_bounds = array<i64: 8, 32>}]} {
    %c0 = arith.constant 0 : index
    %c0_0 = arith.constant 0 : index
    %0 = vector.load %arg2[%c0, %c0_0] : memref<8x32xf32, #tpu.memory_space<vmem>>, vector<8x32xf32>
    %c0_1 = arith.constant 0 : index
    %c0_2 = arith.constant 0 : index
    %1 = vector.load %arg3[%c0_1, %c0_2] : memref<8x32xf32, #tpu.memory_space<vmem>>, vector<8x32xf32>
    %2 = vector.extract_strided_slice %0 {offsets = [0, 0], sizes = [8, 16], strides = [1, 1]} : vector<8x32xf32> to vector<8x16xf32>
    %3 = vector.extract_strided_slice %1 {offsets = [0, 0], sizes = [8, 16], strides = [1, 1]} : vector<8x32xf32> to vector<8x16xf32>
    %c0_3 = arith.constant 0 : index
    %c0_4 = arith.constant 0 : index
    %4 = vector.load %arg4[%c0_3, %c0_4] : memref<4x256xf32, #tpu.memory_space<vmem>>, vector<4x256xf32>
    %5 = tpu.iota {dimensions = array<i32: 0>} : vector<8x8xi32>
    %6 = tpu.iota {dimensions = array<i32: 1>} : vector<8x8xi32>
    %7 = arith.cmpi sge, %5, %6 : vector<8x8xi32>
    %8 = tpu.iota {dimensions = array<i32: 1>} : vector<8x4xi32>
    %9 = arith.sitofp %8 : vector<8x4xi32> to vector<8x4xf32>
    %c0_5 = arith.constant 0 : index
    %c0_6 = arith.constant 0 : index
    %10 = vector.load %arg1[%c0_5, %c0_6] : memref<8x32xf32, #tpu.memory_space<vmem>>, vector<8x32xf32>
    %cst = arith.constant 0.000000e+00 : f32
    %11 = vector.broadcast %cst : f32 to vector<8x32xf32>
    %c0_7 = arith.constant 0 : index
    %c0_8 = arith.constant 0 : index
    %c0_9 = arith.constant 0 : index
    %12 = vector.load %arg6[%c0_7, %c0_8, %c0_9] : memref<2x1x32xf32, #tpu.memory_space<vmem>>, vector<1x1x32xf32>
    %13 = vector.shape_cast %12 : vector<1x1x32xf32> to vector<1x32xf32>
    %c0_10 = arith.constant 0 : index
    %c0_11 = arith.constant 0 : index
    %c0_12 = arith.constant 0 : index
    %14 = vector.load %arg7[%c0_10, %c0_11, %c0_12] : memref<2x32x128xbf16, #tpu.memory_space<vmem>>, vector<1x32x128xbf16>
    %15 = vector.shape_cast %14 : vector<1x32x128xbf16> to vector<32x128xbf16>
    %c0_13 = arith.constant 0 : index
    %c0_14 = arith.constant 0 : index
    %c0_15 = arith.constant 0 : index
    %16 = vector.load %arg8[%c0_13, %c0_14, %c0_15] : memref<2x32x32xbf16, #tpu.memory_space<vmem>>, vector<1x32x32xbf16>
    %17 = vector.shape_cast %16 : vector<1x32x32xbf16> to vector<32x32xbf16>
    %c0_16 = arith.constant 0 : index
    %c0_17 = arith.constant 0 : index
    %c0_18 = arith.constant 0 : index
    %18 = vector.load %arg9[%c0_16, %c0_17, %c0_18] : memref<2x1x32xf32, #tpu.memory_space<vmem>>, vector<1x1x32xf32>
    %19 = vector.shape_cast %18 : vector<1x1x32xf32> to vector<1x32xf32>
    %c0_19 = arith.constant 0 : index
    %c0_20 = arith.constant 0 : index
    %c0_21 = arith.constant 0 : index
    %20 = vector.load %arg10[%c0_19, %c0_20, %c0_21] : memref<2x32x4xf32, #tpu.memory_space<vmem>>, vector<1x32x4xf32>
    %21 = vector.shape_cast %20 : vector<1x32x4xf32> to vector<32x4xf32>
    %c0_22 = arith.constant 0 : index
    %c0_23 = arith.constant 0 : index
    %c0_24 = arith.constant 0 : index
    %22 = vector.load %arg11[%c0_22, %c0_23, %c0_24] : memref<2x32x512xbf16, #tpu.memory_space<vmem>>, vector<1x32x512xbf16>
    %23 = vector.shape_cast %22 : vector<1x32x512xbf16> to vector<32x512xbf16>
    %c0_25 = arith.constant 0 : index
    %c0_26 = arith.constant 0 : index
    %c0_27 = arith.constant 0 : index
    %24 = vector.load %arg12[%c0_25, %c0_26, %c0_27] : memref<2x256x32xbf16, #tpu.memory_space<vmem>>, vector<1x256x32xbf16>
    %25 = vector.shape_cast %24 : vector<1x256x32xbf16> to vector<256x32xbf16>
    %26 = arith.addf %10, %11 : vector<8x32xf32>
    %27 = arith.mulf %26, %26 : vector<8x32xf32>
    %cst_28 = arith.constant dense<0.000000e+00> : vector<8xf32>
    %28 = vector.multi_reduction <add>, %27, %cst_28 [1] : vector<8x32xf32> to vector<8xf32>
    %29 = vector.shape_cast %28 : vector<8xf32> to vector<8x1xf32>
    %cst_29 = arith.constant 3.200000e+01 : f32
    %30 = vector.broadcast %cst_29 : f32 to vector<8x1xf32>
    %31 = arith.divf %29, %30 : vector<8x1xf32>
    %cst_30 = arith.constant 9.99999974E-6 : f32
    %32 = vector.broadcast %cst_30 : f32 to vector<8x1xf32>
    %33 = arith.addf %31, %32 : vector<8x1xf32>
    %34 = math.rsqrt %33 : vector<8x1xf32>
    %35 = vector.broadcast %34 : vector<8x1xf32> to vector<8x32xf32>
    %36 = arith.mulf %26, %35 : vector<8x32xf32>
    %37 = vector.broadcast %13 : vector<1x32xf32> to vector<8x32xf32>
    %38 = arith.mulf %36, %37 : vector<8x32xf32>
    %39 = arith.truncf %38 : vector<8x32xf32> to vector<8x32xbf16>
    %cst_31 = arith.constant dense<0.000000e+00> : vector<8x128xf32>
    %40 = tpu.matmul %39, %15, %cst_31 {dimension_numbers = #tpu.dot_dimension_numbers<[1], [0], [0], [1], [0, 0, 1, 1], [], []>} : vector<8x32xbf16>, vector<32x128xbf16>, vector<8x128xf32> -> vector<8x128xf32>
    %41 = vector.extract_strided_slice %40 {offsets = [0, 0], sizes = [8, 32], strides = [1, 1]} : vector<8x128xf32> to vector<8x32xf32>
    %42 = arith.mulf %41, %0 : vector<8x32xf32>
    %43 = vector.extract_strided_slice %40 {offsets = [0, 32], sizes = [8, 32], strides = [1, 1]} : vector<8x128xf32> to vector<8x32xf32>
    %44 = arith.mulf %43, %1 : vector<8x32xf32>
    %45 = arith.addf %42, %44 : vector<8x32xf32>
    %46 = vector.extract_strided_slice %40 {offsets = [0, 64], sizes = [8, 16], strides = [1, 1]} : vector<8x128xf32> to vector<8x16xf32>
    %47 = arith.mulf %46, %2 : vector<8x16xf32>
    %48 = vector.extract_strided_slice %40 {offsets = [0, 80], sizes = [8, 16], strides = [1, 1]} : vector<8x128xf32> to vector<8x16xf32>
    %49 = arith.mulf %48, %3 : vector<8x16xf32>
    %50 = arith.addf %47, %49 : vector<8x16xf32>
    %51 = vector.extract_strided_slice %40 {offsets = [0, 96], sizes = [8, 16], strides = [1, 1]} : vector<8x128xf32> to vector<8x16xf32>
    %52 = arith.truncf %51 : vector<8x16xf32> to vector<8x16xbf16>
    %cst_32 = arith.constant 0.000000e+00 : f32
    %53 = vector.broadcast %cst_32 : f32 to vector<8x32xf32>
    %54 = vector.extract_strided_slice %45 {offsets = [0, 0], sizes = [8, 8], strides = [1, 1]} : vector<8x32xf32> to vector<8x8xf32>
    %55 = vector.extract_strided_slice %50 {offsets = [0, 0], sizes = [8, 8], strides = [1, 1]} : vector<8x16xf32> to vector<8x8xf32>
    %56 = vector.extract_strided_slice %52 {offsets = [0, 0], sizes = [8, 8], strides = [1, 1]} : vector<8x16xbf16> to vector<8x8xbf16>
    %57 = tpu.transpose %55, [1, 0] : vector<8x8xf32> -> vector<8x8xf32>
    %cst_33 = arith.constant dense<0.000000e+00> : vector<8x8xf32>
    %58 = tpu.matmul %54, %57, %cst_33 {dimension_numbers = #tpu.dot_dimension_numbers<[1], [0], [0], [1], [0, 0, 1, 1], [], []>} : vector<8x8xf32>, vector<8x8xf32>, vector<8x8xf32> -> vector<8x8xf32>
    %cst_34 = arith.constant 0.353553385 : f32
    %59 = vector.broadcast %cst_34 : f32 to vector<8x8xf32>
    %60 = arith.mulf %58, %59 : vector<8x8xf32>
    %cst_35 = arith.constant -1.000000e+30 : f32
    %61 = vector.broadcast %cst_35 : f32 to vector<8x8xf32>
    %62 = arith.select %7, %60, %61 : vector<8x8xi1>, vector<8x8xf32>
    %cst_36 = arith.constant dense<0xFF800000> : vector<8xf32>
    %63 = vector.multi_reduction <maximumf>, %62, %cst_36 [1] : vector<8x8xf32> to vector<8xf32>
    %64 = vector.shape_cast %63 : vector<8xf32> to vector<8x1xf32>
    %65 = vector.broadcast %64 : vector<8x1xf32> to vector<8x8xf32>
    %66 = arith.subf %62, %65 : vector<8x8xf32>
    %67 = math.exp %66 : vector<8x8xf32>
    %cst_37 = arith.constant dense<0.000000e+00> : vector<8xf32>
    %68 = vector.multi_reduction <add>, %67, %cst_37 [1] : vector<8x8xf32> to vector<8xf32>
    %69 = vector.shape_cast %68 : vector<8xf32> to vector<8x1xf32>
    %70 = vector.broadcast %69 : vector<8x1xf32> to vector<8x8xf32>
    %71 = arith.divf %67, %70 : vector<8x8xf32>
    %72 = arith.truncf %71 : vector<8x8xf32> to vector<8x8xbf16>
    %cst_38 = arith.constant dense<0.000000e+00> : vector<8x8xf32>
    %73 = tpu.matmul %72, %56, %cst_38 {dimension_numbers = #tpu.dot_dimension_numbers<[1], [0], [0], [1], [0, 0, 1, 1], [], []>} : vector<8x8xbf16>, vector<8x8xbf16>, vector<8x8xf32> -> vector<8x8xf32>
    %74 = arith.truncf %73 : vector<8x8xf32> to vector<8x8xbf16>
    %75 = vector.extract_strided_slice %17 {offsets = [0, 0], sizes = [8, 32], strides = [1, 1]} : vector<32x32xbf16> to vector<8x32xbf16>
    %cst_39 = arith.constant dense<0.000000e+00> : vector<8x32xf32>
    %76 = tpu.matmul %74, %75, %cst_39 {dimension_numbers = #tpu.dot_dimension_numbers<[1], [0], [0], [1], [0, 0, 1, 1], [], []>} : vector<8x8xbf16>, vector<8x32xbf16>, vector<8x32xf32> -> vector<8x32xf32>
    %77 = arith.addf %53, %76 : vector<8x32xf32>
    %78 = vector.extract_strided_slice %45 {offsets = [0, 8], sizes = [8, 8], strides = [1, 1]} : vector<8x32xf32> to vector<8x8xf32>
    %79 = vector.extract_strided_slice %50 {offsets = [0, 0], sizes = [8, 8], strides = [1, 1]} : vector<8x16xf32> to vector<8x8xf32>
    %80 = vector.extract_strided_slice %52 {offsets = [0, 0], sizes = [8, 8], strides = [1, 1]} : vector<8x16xbf16> to vector<8x8xbf16>
    %81 = tpu.transpose %79, [1, 0] : vector<8x8xf32> -> vector<8x8xf32>
    %cst_40 = arith.constant dense<0.000000e+00> : vector<8x8xf32>
    %82 = tpu.matmul %78, %81, %cst_40 {dimension_numbers = #tpu.dot_dimension_numbers<[1], [0], [0], [1], [0, 0, 1, 1], [], []>} : vector<8x8xf32>, vector<8x8xf32>, vector<8x8xf32> -> vector<8x8xf32>
    %cst_41 = arith.constant 0.353553385 : f32
    %83 = vector.broadcast %cst_41 : f32 to vector<8x8xf32>
    %84 = arith.mulf %82, %83 : vector<8x8xf32>
    %cst_42 = arith.constant -1.000000e+30 : f32
    %85 = vector.broadcast %cst_42 : f32 to vector<8x8xf32>
    %86 = arith.select %7, %84, %85 : vector<8x8xi1>, vector<8x8xf32>
    %cst_43 = arith.constant dense<0xFF800000> : vector<8xf32>
    %87 = vector.multi_reduction <maximumf>, %86, %cst_43 [1] : vector<8x8xf32> to vector<8xf32>
    %88 = vector.shape_cast %87 : vector<8xf32> to vector<8x1xf32>
    %89 = vector.broadcast %88 : vector<8x1xf32> to vector<8x8xf32>
    %90 = arith.subf %86, %89 : vector<8x8xf32>
    %91 = math.exp %90 : vector<8x8xf32>
    %cst_44 = arith.constant dense<0.000000e+00> : vector<8xf32>
    %92 = vector.multi_reduction <add>, %91, %cst_44 [1] : vector<8x8xf32> to vector<8xf32>
    %93 = vector.shape_cast %92 : vector<8xf32> to vector<8x1xf32>
    %94 = vector.broadcast %93 : vector<8x1xf32> to vector<8x8xf32>
    %95 = arith.divf %91, %94 : vector<8x8xf32>
    %96 = arith.truncf %95 : vector<8x8xf32> to vector<8x8xbf16>
    %cst_45 = arith.constant dense<0.000000e+00> : vector<8x8xf32>
    %97 = tpu.matmul %96, %80, %cst_45 {dimension_numbers = #tpu.dot_dimension_numbers<[1], [0], [0], [1], [0, 0, 1, 1], [], []>} : vector<8x8xbf16>, vector<8x8xbf16>, vector<8x8xf32> -> vector<8x8xf32>
    %98 = arith.truncf %97 : vector<8x8xf32> to vector<8x8xbf16>
    %99 = vector.extract_strided_slice %17 {offsets = [8, 0], sizes = [8, 32], strides = [1, 1]} : vector<32x32xbf16> to vector<8x32xbf16>
    %cst_46 = arith.constant dense<0.000000e+00> : vector<8x32xf32>
    %100 = tpu.matmul %98, %99, %cst_46 {dimension_numbers = #tpu.dot_dimension_numbers<[1], [0], [0], [1], [0, 0, 1, 1], [], []>} : vector<8x8xbf16>, vector<8x32xbf16>, vector<8x32xf32> -> vector<8x32xf32>
    %101 = arith.addf %77, %100 : vector<8x32xf32>
    %102 = vector.extract_strided_slice %45 {offsets = [0, 16], sizes = [8, 8], strides = [1, 1]} : vector<8x32xf32> to vector<8x8xf32>
    %103 = vector.extract_strided_slice %50 {offsets = [0, 8], sizes = [8, 8], strides = [1, 1]} : vector<8x16xf32> to vector<8x8xf32>
    %104 = vector.extract_strided_slice %52 {offsets = [0, 8], sizes = [8, 8], strides = [1, 1]} : vector<8x16xbf16> to vector<8x8xbf16>
    %105 = tpu.transpose %103, [1, 0] : vector<8x8xf32> -> vector<8x8xf32>
    %cst_47 = arith.constant dense<0.000000e+00> : vector<8x8xf32>
    %106 = tpu.matmul %102, %105, %cst_47 {dimension_numbers = #tpu.dot_dimension_numbers<[1], [0], [0], [1], [0, 0, 1, 1], [], []>} : vector<8x8xf32>, vector<8x8xf32>, vector<8x8xf32> -> vector<8x8xf32>
    %cst_48 = arith.constant 0.353553385 : f32
    %107 = vector.broadcast %cst_48 : f32 to vector<8x8xf32>
    %108 = arith.mulf %106, %107 : vector<8x8xf32>
    %cst_49 = arith.constant -1.000000e+30 : f32
    %109 = vector.broadcast %cst_49 : f32 to vector<8x8xf32>
    %110 = arith.select %7, %108, %109 : vector<8x8xi1>, vector<8x8xf32>
    %cst_50 = arith.constant dense<0xFF800000> : vector<8xf32>
    %111 = vector.multi_reduction <maximumf>, %110, %cst_50 [1] : vector<8x8xf32> to vector<8xf32>
    %112 = vector.shape_cast %111 : vector<8xf32> to vector<8x1xf32>
    %113 = vector.broadcast %112 : vector<8x1xf32> to vector<8x8xf32>
    %114 = arith.subf %110, %113 : vector<8x8xf32>
    %115 = math.exp %114 : vector<8x8xf32>
    %cst_51 = arith.constant dense<0.000000e+00> : vector<8xf32>
    %116 = vector.multi_reduction <add>, %115, %cst_51 [1] : vector<8x8xf32> to vector<8xf32>
    %117 = vector.shape_cast %116 : vector<8xf32> to vector<8x1xf32>
    %118 = vector.broadcast %117 : vector<8x1xf32> to vector<8x8xf32>
    %119 = arith.divf %115, %118 : vector<8x8xf32>
    %120 = arith.truncf %119 : vector<8x8xf32> to vector<8x8xbf16>
    %cst_52 = arith.constant dense<0.000000e+00> : vector<8x8xf32>
    %121 = tpu.matmul %120, %104, %cst_52 {dimension_numbers = #tpu.dot_dimension_numbers<[1], [0], [0], [1], [0, 0, 1, 1], [], []>} : vector<8x8xbf16>, vector<8x8xbf16>, vector<8x8xf32> -> vector<8x8xf32>
    %122 = arith.truncf %121 : vector<8x8xf32> to vector<8x8xbf16>
    %123 = vector.extract_strided_slice %17 {offsets = [16, 0], sizes = [8, 32], strides = [1, 1]} : vector<32x32xbf16> to vector<8x32xbf16>
    %cst_53 = arith.constant dense<0.000000e+00> : vector<8x32xf32>
    %124 = tpu.matmul %122, %123, %cst_53 {dimension_numbers = #tpu.dot_dimension_numbers<[1], [0], [0], [1], [0, 0, 1, 1], [], []>} : vector<8x8xbf16>, vector<8x32xbf16>, vector<8x32xf32> -> vector<8x32xf32>
    %125 = arith.addf %101, %124 : vector<8x32xf32>
    %126 = vector.extract_strided_slice %45 {offsets = [0, 24], sizes = [8, 8], strides = [1, 1]} : vector<8x32xf32> to vector<8x8xf32>
    %127 = vector.extract_strided_slice %50 {offsets = [0, 8], sizes = [8, 8], strides = [1, 1]} : vector<8x16xf32> to vector<8x8xf32>
    %128 = vector.extract_strided_slice %52 {offsets = [0, 8], sizes = [8, 8], strides = [1, 1]} : vector<8x16xbf16> to vector<8x8xbf16>
    %129 = tpu.transpose %127, [1, 0] : vector<8x8xf32> -> vector<8x8xf32>
    %cst_54 = arith.constant dense<0.000000e+00> : vector<8x8xf32>
    %130 = tpu.matmul %126, %129, %cst_54 {dimension_numbers = #tpu.dot_dimension_numbers<[1], [0], [0], [1], [0, 0, 1, 1], [], []>} : vector<8x8xf32>, vector<8x8xf32>, vector<8x8xf32> -> vector<8x8xf32>
    %cst_55 = arith.constant 0.353553385 : f32
    %131 = vector.broadcast %cst_55 : f32 to vector<8x8xf32>
    %132 = arith.mulf %130, %131 : vector<8x8xf32>
    %cst_56 = arith.constant -1.000000e+30 : f32
    %133 = vector.broadcast %cst_56 : f32 to vector<8x8xf32>
    %134 = arith.select %7, %132, %133 : vector<8x8xi1>, vector<8x8xf32>
    %cst_57 = arith.constant dense<0xFF800000> : vector<8xf32>
    %135 = vector.multi_reduction <maximumf>, %134, %cst_57 [1] : vector<8x8xf32> to vector<8xf32>
    %136 = vector.shape_cast %135 : vector<8xf32> to vector<8x1xf32>
    %137 = vector.broadcast %136 : vector<8x1xf32> to vector<8x8xf32>
    %138 = arith.subf %134, %137 : vector<8x8xf32>
    %139 = math.exp %138 : vector<8x8xf32>
    %cst_58 = arith.constant dense<0.000000e+00> : vector<8xf32>
    %140 = vector.multi_reduction <add>, %139, %cst_58 [1] : vector<8x8xf32> to vector<8xf32>
    %141 = vector.shape_cast %140 : vector<8xf32> to vector<8x1xf32>
    %142 = vector.broadcast %141 : vector<8x1xf32> to vector<8x8xf32>
    %143 = arith.divf %139, %142 : vector<8x8xf32>
    %144 = arith.truncf %143 : vector<8x8xf32> to vector<8x8xbf16>
    %cst_59 = arith.constant dense<0.000000e+00> : vector<8x8xf32>
    %145 = tpu.matmul %144, %128, %cst_59 {dimension_numbers = #tpu.dot_dimension_numbers<[1], [0], [0], [1], [0, 0, 1, 1], [], []>} : vector<8x8xbf16>, vector<8x8xbf16>, vector<8x8xf32> -> vector<8x8xf32>
    %146 = arith.truncf %145 : vector<8x8xf32> to vector<8x8xbf16>
    %147 = vector.extract_strided_slice %17 {offsets = [24, 0], sizes = [8, 32], strides = [1, 1]} : vector<32x32xbf16> to vector<8x32xbf16>
    %cst_60 = arith.constant dense<0.000000e+00> : vector<8x32xf32>
    %148 = tpu.matmul %146, %147, %cst_60 {dimension_numbers = #tpu.dot_dimension_numbers<[1], [0], [0], [1], [0, 0, 1, 1], [], []>} : vector<8x8xbf16>, vector<8x32xbf16>, vector<8x32xf32> -> vector<8x32xf32>
    %149 = arith.addf %125, %148 : vector<8x32xf32>
    %150 = arith.addf %149, %26 : vector<8x32xf32>
    %151 = arith.mulf %150, %150 : vector<8x32xf32>
    %cst_61 = arith.constant dense<0.000000e+00> : vector<8xf32>
    %152 = vector.multi_reduction <add>, %151, %cst_61 [1] : vector<8x32xf32> to vector<8xf32>
    %153 = vector.shape_cast %152 : vector<8xf32> to vector<8x1xf32>
    %cst_62 = arith.constant 3.200000e+01 : f32
    %154 = vector.broadcast %cst_62 : f32 to vector<8x1xf32>
    %155 = arith.divf %153, %154 : vector<8x1xf32>
    %cst_63 = arith.constant 9.99999974E-6 : f32
    %156 = vector.broadcast %cst_63 : f32 to vector<8x1xf32>
    %157 = arith.addf %155, %156 : vector<8x1xf32>
    %158 = math.rsqrt %157 : vector<8x1xf32>
    %159 = vector.broadcast %158 : vector<8x1xf32> to vector<8x32xf32>
    %160 = arith.mulf %150, %159 : vector<8x32xf32>
    %161 = vector.broadcast %19 : vector<1x32xf32> to vector<8x32xf32>
    %162 = arith.mulf %160, %161 : vector<8x32xf32>
    %163 = arith.truncf %162 : vector<8x32xf32> to vector<8x32xbf16>
    %cst_64 = arith.constant dense<0.000000e+00> : vector<8x4xf32>
    %164 = tpu.matmul %162, %21, %cst_64 {dimension_numbers = #tpu.dot_dimension_numbers<[1], [0], [0], [1], [0, 0, 1, 1], [], []>} : vector<8x32xf32>, vector<32x4xf32>, vector<8x4xf32> -> vector<8x4xf32>
    %cst_65 = arith.constant dense<0xFF800000> : vector<8xf32>
    %165 = vector.multi_reduction <maximumf>, %164, %cst_65 [1] : vector<8x4xf32> to vector<8xf32>
    %166 = vector.shape_cast %165 : vector<8xf32> to vector<8x1xf32>
    %167 = vector.broadcast %166 : vector<8x1xf32> to vector<8x4xf32>
    %168 = arith.cmpf oeq, %164, %167 : vector<8x4xf32>
    %cst_66 = arith.constant 4.000000e+00 : f32
    %169 = vector.broadcast %cst_66 : f32 to vector<8x4xf32>
    %170 = arith.select %168, %9, %169 : vector<8x4xi1>, vector<8x4xf32>
    %cst_67 = arith.constant dense<0x7F800000> : vector<8xf32>
    %171 = vector.multi_reduction <minimumf>, %170, %cst_67 [1] : vector<8x4xf32> to vector<8xf32>
    %172 = vector.shape_cast %171 : vector<8xf32> to vector<8x1xf32>
    %173 = vector.broadcast %172 : vector<8x1xf32> to vector<8x4xf32>
    %174 = arith.cmpf oeq, %9, %173 : vector<8x4xf32>
    %cst_68 = arith.constant -1.000000e+30 : f32
    %175 = vector.broadcast %cst_68 : f32 to vector<8x4xf32>
    %176 = arith.select %174, %175, %164 : vector<8x4xi1>, vector<8x4xf32>
    %cst_69 = arith.constant dense<0xFF800000> : vector<8xf32>
    %177 = vector.multi_reduction <maximumf>, %176, %cst_69 [1] : vector<8x4xf32> to vector<8xf32>
    %178 = vector.shape_cast %177 : vector<8xf32> to vector<8x1xf32>
    %179 = vector.broadcast %178 : vector<8x1xf32> to vector<8x4xf32>
    %180 = arith.cmpf oeq, %176, %179 : vector<8x4xf32>
    %cst_70 = arith.constant 4.000000e+00 : f32
    %181 = vector.broadcast %cst_70 : f32 to vector<8x4xf32>
    %182 = arith.select %180, %9, %181 : vector<8x4xi1>, vector<8x4xf32>
    %cst_71 = arith.constant dense<0x7F800000> : vector<8xf32>
    %183 = vector.multi_reduction <minimumf>, %182, %cst_71 [1] : vector<8x4xf32> to vector<8xf32>
    %184 = vector.shape_cast %183 : vector<8xf32> to vector<8x1xf32>
    %185 = vector.broadcast %184 : vector<8x1xf32> to vector<8x4xf32>
    %186 = arith.cmpf oeq, %9, %185 : vector<8x4xf32>
    %187 = arith.ori %174, %186 : vector<8x4xi1>
    %188 = vector.broadcast %166 : vector<8x1xf32> to vector<8x4xf32>
    %189 = arith.subf %164, %188 : vector<8x4xf32>
    %190 = math.exp %189 : vector<8x4xf32>
    %cst_72 = arith.constant 0.000000e+00 : f32
    %191 = vector.broadcast %cst_72 : f32 to vector<8x4xf32>
    %192 = arith.select %187, %190, %191 : vector<8x4xi1>, vector<8x4xf32>
    %cst_73 = arith.constant dense<0.000000e+00> : vector<8xf32>
    %193 = vector.multi_reduction <add>, %192, %cst_73 [1] : vector<8x4xf32> to vector<8xf32>
    %194 = vector.shape_cast %193 : vector<8xf32> to vector<8x1xf32>
    %195 = vector.broadcast %194 : vector<8x1xf32> to vector<8x4xf32>
    %196 = arith.divf %192, %195 : vector<8x4xf32>
    %cst_74 = arith.constant dense<0.000000e+00> : vector<8x512xf32>
    %197 = tpu.matmul %163, %23, %cst_74 {dimension_numbers = #tpu.dot_dimension_numbers<[1], [0], [0], [1], [0, 0, 1, 1], [], []>} : vector<8x32xbf16>, vector<32x512xbf16>, vector<8x512xf32> -> vector<8x512xf32>
    %198 = vector.extract_strided_slice %197 {offsets = [0, 0], sizes = [8, 256], strides = [1, 1]} : vector<8x512xf32> to vector<8x256xf32>
    %199 = vector.extract_strided_slice %197 {offsets = [0, 256], sizes = [8, 256], strides = [1, 1]} : vector<8x512xf32> to vector<8x256xf32>
    %200 = arith.negf %198 : vector<8x256xf32>
    %201 = math.exp %200 : vector<8x256xf32>
    %cst_75 = arith.constant 1.000000e+00 : f32
    %202 = vector.broadcast %cst_75 : f32 to vector<8x256xf32>
    %203 = arith.addf %202, %201 : vector<8x256xf32>
    %204 = arith.divf %202, %203 : vector<8x256xf32>
    %205 = arith.mulf %198, %204 : vector<8x256xf32>
    %206 = arith.mulf %205, %199 : vector<8x256xf32>
    %cst_76 = arith.constant dense<0.000000e+00> : vector<8x256xf32>
    %207 = tpu.matmul %196, %4, %cst_76 {dimension_numbers = #tpu.dot_dimension_numbers<[1], [0], [0], [1], [0, 0, 1, 1], [], []>} : vector<8x4xf32>, vector<4x256xf32>, vector<8x256xf32> -> vector<8x256xf32>
    %208 = arith.mulf %206, %207 : vector<8x256xf32>
    %209 = arith.truncf %208 : vector<8x256xf32> to vector<8x256xbf16>
    %cst_77 = arith.constant dense<0.000000e+00> : vector<8x32xf32>
    %210 = tpu.matmul %209, %25, %cst_77 {dimension_numbers = #tpu.dot_dimension_numbers<[1], [0], [0], [1], [0, 0, 1, 1], [], []>} : vector<8x256xbf16>, vector<256x32xbf16>, vector<8x32xf32> -> vector<8x32xf32>
    %c1 = arith.constant 1 : index
    %c0_78 = arith.constant 0 : index
    %c0_79 = arith.constant 0 : index
    %211 = vector.load %arg6[%c1, %c0_78, %c0_79] : memref<2x1x32xf32, #tpu.memory_space<vmem>>, vector<1x1x32xf32>
    %212 = vector.shape_cast %211 : vector<1x1x32xf32> to vector<1x32xf32>
    %c1_80 = arith.constant 1 : index
    %c0_81 = arith.constant 0 : index
    %c0_82 = arith.constant 0 : index
    %213 = vector.load %arg7[%c1_80, %c0_81, %c0_82] : memref<2x32x128xbf16, #tpu.memory_space<vmem>>, vector<1x32x128xbf16>
    %214 = vector.shape_cast %213 : vector<1x32x128xbf16> to vector<32x128xbf16>
    %c1_83 = arith.constant 1 : index
    %c0_84 = arith.constant 0 : index
    %c0_85 = arith.constant 0 : index
    %215 = vector.load %arg8[%c1_83, %c0_84, %c0_85] : memref<2x32x32xbf16, #tpu.memory_space<vmem>>, vector<1x32x32xbf16>
    %216 = vector.shape_cast %215 : vector<1x32x32xbf16> to vector<32x32xbf16>
    %c1_86 = arith.constant 1 : index
    %c0_87 = arith.constant 0 : index
    %c0_88 = arith.constant 0 : index
    %217 = vector.load %arg9[%c1_86, %c0_87, %c0_88] : memref<2x1x32xf32, #tpu.memory_space<vmem>>, vector<1x1x32xf32>
    %218 = vector.shape_cast %217 : vector<1x1x32xf32> to vector<1x32xf32>
    %c1_89 = arith.constant 1 : index
    %c0_90 = arith.constant 0 : index
    %c0_91 = arith.constant 0 : index
    %219 = vector.load %arg10[%c1_89, %c0_90, %c0_91] : memref<2x32x4xf32, #tpu.memory_space<vmem>>, vector<1x32x4xf32>
    %220 = vector.shape_cast %219 : vector<1x32x4xf32> to vector<32x4xf32>
    %c1_92 = arith.constant 1 : index
    %c0_93 = arith.constant 0 : index
    %c0_94 = arith.constant 0 : index
    %221 = vector.load %arg11[%c1_92, %c0_93, %c0_94] : memref<2x32x512xbf16, #tpu.memory_space<vmem>>, vector<1x32x512xbf16>
    %222 = vector.shape_cast %221 : vector<1x32x512xbf16> to vector<32x512xbf16>
    %c1_95 = arith.constant 1 : index
    %c0_96 = arith.constant 0 : index
    %c0_97 = arith.constant 0 : index
    %223 = vector.load %arg12[%c1_95, %c0_96, %c0_97] : memref<2x256x32xbf16, #tpu.memory_space<vmem>>, vector<1x256x32xbf16>
    %224 = vector.shape_cast %223 : vector<1x256x32xbf16> to vector<256x32xbf16>
    %225 = arith.addf %210, %150 : vector<8x32xf32>
    %226 = arith.mulf %225, %225 : vector<8x32xf32>
    %cst_98 = arith.constant dense<0.000000e+00> : vector<8xf32>
    %227 = vector.multi_reduction <add>, %226, %cst_98 [1] : vector<8x32xf32> to vector<8xf32>
    %228 = vector.shape_cast %227 : vector<8xf32> to vector<8x1xf32>
    %cst_99 = arith.constant 3.200000e+01 : f32
    %229 = vector.broadcast %cst_99 : f32 to vector<8x1xf32>
    %230 = arith.divf %228, %229 : vector<8x1xf32>
    %cst_100 = arith.constant 9.99999974E-6 : f32
    %231 = vector.broadcast %cst_100 : f32 to vector<8x1xf32>
    %232 = arith.addf %230, %231 : vector<8x1xf32>
    %233 = math.rsqrt %232 : vector<8x1xf32>
    %234 = vector.broadcast %233 : vector<8x1xf32> to vector<8x32xf32>
    %235 = arith.mulf %225, %234 : vector<8x32xf32>
    %236 = vector.broadcast %212 : vector<1x32xf32> to vector<8x32xf32>
    %237 = arith.mulf %235, %236 : vector<8x32xf32>
    %238 = arith.truncf %237 : vector<8x32xf32> to vector<8x32xbf16>
    %cst_101 = arith.constant dense<0.000000e+00> : vector<8x128xf32>
    %239 = tpu.matmul %238, %214, %cst_101 {dimension_numbers = #tpu.dot_dimension_numbers<[1], [0], [0], [1], [0, 0, 1, 1], [], []>} : vector<8x32xbf16>, vector<32x128xbf16>, vector<8x128xf32> -> vector<8x128xf32>
    %240 = vector.extract_strided_slice %239 {offsets = [0, 0], sizes = [8, 32], strides = [1, 1]} : vector<8x128xf32> to vector<8x32xf32>
    %241 = arith.mulf %240, %0 : vector<8x32xf32>
    %242 = vector.extract_strided_slice %239 {offsets = [0, 32], sizes = [8, 32], strides = [1, 1]} : vector<8x128xf32> to vector<8x32xf32>
    %243 = arith.mulf %242, %1 : vector<8x32xf32>
    %244 = arith.addf %241, %243 : vector<8x32xf32>
    %245 = vector.extract_strided_slice %239 {offsets = [0, 64], sizes = [8, 16], strides = [1, 1]} : vector<8x128xf32> to vector<8x16xf32>
    %246 = arith.mulf %245, %2 : vector<8x16xf32>
    %247 = vector.extract_strided_slice %239 {offsets = [0, 80], sizes = [8, 16], strides = [1, 1]} : vector<8x128xf32> to vector<8x16xf32>
    %248 = arith.mulf %247, %3 : vector<8x16xf32>
    %249 = arith.addf %246, %248 : vector<8x16xf32>
    %250 = vector.extract_strided_slice %239 {offsets = [0, 96], sizes = [8, 16], strides = [1, 1]} : vector<8x128xf32> to vector<8x16xf32>
    %251 = arith.truncf %250 : vector<8x16xf32> to vector<8x16xbf16>
    %cst_102 = arith.constant 0.000000e+00 : f32
    %252 = vector.broadcast %cst_102 : f32 to vector<8x32xf32>
    %253 = vector.extract_strided_slice %244 {offsets = [0, 0], sizes = [8, 8], strides = [1, 1]} : vector<8x32xf32> to vector<8x8xf32>
    %254 = vector.extract_strided_slice %249 {offsets = [0, 0], sizes = [8, 8], strides = [1, 1]} : vector<8x16xf32> to vector<8x8xf32>
    %255 = vector.extract_strided_slice %251 {offsets = [0, 0], sizes = [8, 8], strides = [1, 1]} : vector<8x16xbf16> to vector<8x8xbf16>
    %256 = tpu.transpose %254, [1, 0] : vector<8x8xf32> -> vector<8x8xf32>
    %cst_103 = arith.constant dense<0.000000e+00> : vector<8x8xf32>
    %257 = tpu.matmul %253, %256, %cst_103 {dimension_numbers = #tpu.dot_dimension_numbers<[1], [0], [0], [1], [0, 0, 1, 1], [], []>} : vector<8x8xf32>, vector<8x8xf32>, vector<8x8xf32> -> vector<8x8xf32>
    %cst_104 = arith.constant 0.353553385 : f32
    %258 = vector.broadcast %cst_104 : f32 to vector<8x8xf32>
    %259 = arith.mulf %257, %258 : vector<8x8xf32>
    %cst_105 = arith.constant -1.000000e+30 : f32
    %260 = vector.broadcast %cst_105 : f32 to vector<8x8xf32>
    %261 = arith.select %7, %259, %260 : vector<8x8xi1>, vector<8x8xf32>
    %cst_106 = arith.constant dense<0xFF800000> : vector<8xf32>
    %262 = vector.multi_reduction <maximumf>, %261, %cst_106 [1] : vector<8x8xf32> to vector<8xf32>
    %263 = vector.shape_cast %262 : vector<8xf32> to vector<8x1xf32>
    %264 = vector.broadcast %263 : vector<8x1xf32> to vector<8x8xf32>
    %265 = arith.subf %261, %264 : vector<8x8xf32>
    %266 = math.exp %265 : vector<8x8xf32>
    %cst_107 = arith.constant dense<0.000000e+00> : vector<8xf32>
    %267 = vector.multi_reduction <add>, %266, %cst_107 [1] : vector<8x8xf32> to vector<8xf32>
    %268 = vector.shape_cast %267 : vector<8xf32> to vector<8x1xf32>
    %269 = vector.broadcast %268 : vector<8x1xf32> to vector<8x8xf32>
    %270 = arith.divf %266, %269 : vector<8x8xf32>
    %271 = arith.truncf %270 : vector<8x8xf32> to vector<8x8xbf16>
    %cst_108 = arith.constant dense<0.000000e+00> : vector<8x8xf32>
    %272 = tpu.matmul %271, %255, %cst_108 {dimension_numbers = #tpu.dot_dimension_numbers<[1], [0], [0], [1], [0, 0, 1, 1], [], []>} : vector<8x8xbf16>, vector<8x8xbf16>, vector<8x8xf32> -> vector<8x8xf32>
    %273 = arith.truncf %272 : vector<8x8xf32> to vector<8x8xbf16>
    %274 = vector.extract_strided_slice %216 {offsets = [0, 0], sizes = [8, 32], strides = [1, 1]} : vector<32x32xbf16> to vector<8x32xbf16>
    %cst_109 = arith.constant dense<0.000000e+00> : vector<8x32xf32>
    %275 = tpu.matmul %273, %274, %cst_109 {dimension_numbers = #tpu.dot_dimension_numbers<[1], [0], [0], [1], [0, 0, 1, 1], [], []>} : vector<8x8xbf16>, vector<8x32xbf16>, vector<8x32xf32> -> vector<8x32xf32>
    %276 = arith.addf %252, %275 : vector<8x32xf32>
    %277 = vector.extract_strided_slice %244 {offsets = [0, 8], sizes = [8, 8], strides = [1, 1]} : vector<8x32xf32> to vector<8x8xf32>
    %278 = vector.extract_strided_slice %249 {offsets = [0, 0], sizes = [8, 8], strides = [1, 1]} : vector<8x16xf32> to vector<8x8xf32>
    %279 = vector.extract_strided_slice %251 {offsets = [0, 0], sizes = [8, 8], strides = [1, 1]} : vector<8x16xbf16> to vector<8x8xbf16>
    %280 = tpu.transpose %278, [1, 0] : vector<8x8xf32> -> vector<8x8xf32>
    %cst_110 = arith.constant dense<0.000000e+00> : vector<8x8xf32>
    %281 = tpu.matmul %277, %280, %cst_110 {dimension_numbers = #tpu.dot_dimension_numbers<[1], [0], [0], [1], [0, 0, 1, 1], [], []>} : vector<8x8xf32>, vector<8x8xf32>, vector<8x8xf32> -> vector<8x8xf32>
    %cst_111 = arith.constant 0.353553385 : f32
    %282 = vector.broadcast %cst_111 : f32 to vector<8x8xf32>
    %283 = arith.mulf %281, %282 : vector<8x8xf32>
    %cst_112 = arith.constant -1.000000e+30 : f32
    %284 = vector.broadcast %cst_112 : f32 to vector<8x8xf32>
    %285 = arith.select %7, %283, %284 : vector<8x8xi1>, vector<8x8xf32>
    %cst_113 = arith.constant dense<0xFF800000> : vector<8xf32>
    %286 = vector.multi_reduction <maximumf>, %285, %cst_113 [1] : vector<8x8xf32> to vector<8xf32>
    %287 = vector.shape_cast %286 : vector<8xf32> to vector<8x1xf32>
    %288 = vector.broadcast %287 : vector<8x1xf32> to vector<8x8xf32>
    %289 = arith.subf %285, %288 : vector<8x8xf32>
    %290 = math.exp %289 : vector<8x8xf32>
    %cst_114 = arith.constant dense<0.000000e+00> : vector<8xf32>
    %291 = vector.multi_reduction <add>, %290, %cst_114 [1] : vector<8x8xf32> to vector<8xf32>
    %292 = vector.shape_cast %291 : vector<8xf32> to vector<8x1xf32>
    %293 = vector.broadcast %292 : vector<8x1xf32> to vector<8x8xf32>
    %294 = arith.divf %290, %293 : vector<8x8xf32>
    %295 = arith.truncf %294 : vector<8x8xf32> to vector<8x8xbf16>
    %cst_115 = arith.constant dense<0.000000e+00> : vector<8x8xf32>
    %296 = tpu.matmul %295, %279, %cst_115 {dimension_numbers = #tpu.dot_dimension_numbers<[1], [0], [0], [1], [0, 0, 1, 1], [], []>} : vector<8x8xbf16>, vector<8x8xbf16>, vector<8x8xf32> -> vector<8x8xf32>
    %297 = arith.truncf %296 : vector<8x8xf32> to vector<8x8xbf16>
    %298 = vector.extract_strided_slice %216 {offsets = [8, 0], sizes = [8, 32], strides = [1, 1]} : vector<32x32xbf16> to vector<8x32xbf16>
    %cst_116 = arith.constant dense<0.000000e+00> : vector<8x32xf32>
    %299 = tpu.matmul %297, %298, %cst_116 {dimension_numbers = #tpu.dot_dimension_numbers<[1], [0], [0], [1], [0, 0, 1, 1], [], []>} : vector<8x8xbf16>, vector<8x32xbf16>, vector<8x32xf32> -> vector<8x32xf32>
    %300 = arith.addf %276, %299 : vector<8x32xf32>
    %301 = vector.extract_strided_slice %244 {offsets = [0, 16], sizes = [8, 8], strides = [1, 1]} : vector<8x32xf32> to vector<8x8xf32>
    %302 = vector.extract_strided_slice %249 {offsets = [0, 8], sizes = [8, 8], strides = [1, 1]} : vector<8x16xf32> to vector<8x8xf32>
    %303 = vector.extract_strided_slice %251 {offsets = [0, 8], sizes = [8, 8], strides = [1, 1]} : vector<8x16xbf16> to vector<8x8xbf16>
    %304 = tpu.transpose %302, [1, 0] : vector<8x8xf32> -> vector<8x8xf32>
    %cst_117 = arith.constant dense<0.000000e+00> : vector<8x8xf32>
    %305 = tpu.matmul %301, %304, %cst_117 {dimension_numbers = #tpu.dot_dimension_numbers<[1], [0], [0], [1], [0, 0, 1, 1], [], []>} : vector<8x8xf32>, vector<8x8xf32>, vector<8x8xf32> -> vector<8x8xf32>
    %cst_118 = arith.constant 0.353553385 : f32
    %306 = vector.broadcast %cst_118 : f32 to vector<8x8xf32>
    %307 = arith.mulf %305, %306 : vector<8x8xf32>
    %cst_119 = arith.constant -1.000000e+30 : f32
    %308 = vector.broadcast %cst_119 : f32 to vector<8x8xf32>
    %309 = arith.select %7, %307, %308 : vector<8x8xi1>, vector<8x8xf32>
    %cst_120 = arith.constant dense<0xFF800000> : vector<8xf32>
    %310 = vector.multi_reduction <maximumf>, %309, %cst_120 [1] : vector<8x8xf32> to vector<8xf32>
    %311 = vector.shape_cast %310 : vector<8xf32> to vector<8x1xf32>
    %312 = vector.broadcast %311 : vector<8x1xf32> to vector<8x8xf32>
    %313 = arith.subf %309, %312 : vector<8x8xf32>
    %314 = math.exp %313 : vector<8x8xf32>
    %cst_121 = arith.constant dense<0.000000e+00> : vector<8xf32>
    %315 = vector.multi_reduction <add>, %314, %cst_121 [1] : vector<8x8xf32> to vector<8xf32>
    %316 = vector.shape_cast %315 : vector<8xf32> to vector<8x1xf32>
    %317 = vector.broadcast %316 : vector<8x1xf32> to vector<8x8xf32>
    %318 = arith.divf %314, %317 : vector<8x8xf32>
    %319 = arith.truncf %318 : vector<8x8xf32> to vector<8x8xbf16>
    %cst_122 = arith.constant dense<0.000000e+00> : vector<8x8xf32>
    %320 = tpu.matmul %319, %303, %cst_122 {dimension_numbers = #tpu.dot_dimension_numbers<[1], [0], [0], [1], [0, 0, 1, 1], [], []>} : vector<8x8xbf16>, vector<8x8xbf16>, vector<8x8xf32> -> vector<8x8xf32>
    %321 = arith.truncf %320 : vector<8x8xf32> to vector<8x8xbf16>
    %322 = vector.extract_strided_slice %216 {offsets = [16, 0], sizes = [8, 32], strides = [1, 1]} : vector<32x32xbf16> to vector<8x32xbf16>
    %cst_123 = arith.constant dense<0.000000e+00> : vector<8x32xf32>
    %323 = tpu.matmul %321, %322, %cst_123 {dimension_numbers = #tpu.dot_dimension_numbers<[1], [0], [0], [1], [0, 0, 1, 1], [], []>} : vector<8x8xbf16>, vector<8x32xbf16>, vector<8x32xf32> -> vector<8x32xf32>
    %324 = arith.addf %300, %323 : vector<8x32xf32>
    %325 = vector.extract_strided_slice %244 {offsets = [0, 24], sizes = [8, 8], strides = [1, 1]} : vector<8x32xf32> to vector<8x8xf32>
    %326 = vector.extract_strided_slice %249 {offsets = [0, 8], sizes = [8, 8], strides = [1, 1]} : vector<8x16xf32> to vector<8x8xf32>
    %327 = vector.extract_strided_slice %251 {offsets = [0, 8], sizes = [8, 8], strides = [1, 1]} : vector<8x16xbf16> to vector<8x8xbf16>
    %328 = tpu.transpose %326, [1, 0] : vector<8x8xf32> -> vector<8x8xf32>
    %cst_124 = arith.constant dense<0.000000e+00> : vector<8x8xf32>
    %329 = tpu.matmul %325, %328, %cst_124 {dimension_numbers = #tpu.dot_dimension_numbers<[1], [0], [0], [1], [0, 0, 1, 1], [], []>} : vector<8x8xf32>, vector<8x8xf32>, vector<8x8xf32> -> vector<8x8xf32>
    %cst_125 = arith.constant 0.353553385 : f32
    %330 = vector.broadcast %cst_125 : f32 to vector<8x8xf32>
    %331 = arith.mulf %329, %330 : vector<8x8xf32>
    %cst_126 = arith.constant -1.000000e+30 : f32
    %332 = vector.broadcast %cst_126 : f32 to vector<8x8xf32>
    %333 = arith.select %7, %331, %332 : vector<8x8xi1>, vector<8x8xf32>
    %cst_127 = arith.constant dense<0xFF800000> : vector<8xf32>
    %334 = vector.multi_reduction <maximumf>, %333, %cst_127 [1] : vector<8x8xf32> to vector<8xf32>
    %335 = vector.shape_cast %334 : vector<8xf32> to vector<8x1xf32>
    %336 = vector.broadcast %335 : vector<8x1xf32> to vector<8x8xf32>
    %337 = arith.subf %333, %336 : vector<8x8xf32>
    %338 = math.exp %337 : vector<8x8xf32>
    %cst_128 = arith.constant dense<0.000000e+00> : vector<8xf32>
    %339 = vector.multi_reduction <add>, %338, %cst_128 [1] : vector<8x8xf32> to vector<8xf32>
    %340 = vector.shape_cast %339 : vector<8xf32> to vector<8x1xf32>
    %341 = vector.broadcast %340 : vector<8x1xf32> to vector<8x8xf32>
    %342 = arith.divf %338, %341 : vector<8x8xf32>
    %343 = arith.truncf %342 : vector<8x8xf32> to vector<8x8xbf16>
    %cst_129 = arith.constant dense<0.000000e+00> : vector<8x8xf32>
    %344 = tpu.matmul %343, %327, %cst_129 {dimension_numbers = #tpu.dot_dimension_numbers<[1], [0], [0], [1], [0, 0, 1, 1], [], []>} : vector<8x8xbf16>, vector<8x8xbf16>, vector<8x8xf32> -> vector<8x8xf32>
    %345 = arith.truncf %344 : vector<8x8xf32> to vector<8x8xbf16>
    %346 = vector.extract_strided_slice %216 {offsets = [24, 0], sizes = [8, 32], strides = [1, 1]} : vector<32x32xbf16> to vector<8x32xbf16>
    %cst_130 = arith.constant dense<0.000000e+00> : vector<8x32xf32>
    %347 = tpu.matmul %345, %346, %cst_130 {dimension_numbers = #tpu.dot_dimension_numbers<[1], [0], [0], [1], [0, 0, 1, 1], [], []>} : vector<8x8xbf16>, vector<8x32xbf16>, vector<8x32xf32> -> vector<8x32xf32>
    %348 = arith.addf %324, %347 : vector<8x32xf32>
    %349 = arith.addf %348, %225 : vector<8x32xf32>
    %350 = arith.mulf %349, %349 : vector<8x32xf32>
    %cst_131 = arith.constant dense<0.000000e+00> : vector<8xf32>
    %351 = vector.multi_reduction <add>, %350, %cst_131 [1] : vector<8x32xf32> to vector<8xf32>
    %352 = vector.shape_cast %351 : vector<8xf32> to vector<8x1xf32>
    %cst_132 = arith.constant 3.200000e+01 : f32
    %353 = vector.broadcast %cst_132 : f32 to vector<8x1xf32>
    %354 = arith.divf %352, %353 : vector<8x1xf32>
    %cst_133 = arith.constant 9.99999974E-6 : f32
    %355 = vector.broadcast %cst_133 : f32 to vector<8x1xf32>
    %356 = arith.addf %354, %355 : vector<8x1xf32>
    %357 = math.rsqrt %356 : vector<8x1xf32>
    %358 = vector.broadcast %357 : vector<8x1xf32> to vector<8x32xf32>
    %359 = arith.mulf %349, %358 : vector<8x32xf32>
    %360 = vector.broadcast %218 : vector<1x32xf32> to vector<8x32xf32>
    %361 = arith.mulf %359, %360 : vector<8x32xf32>
    %362 = arith.truncf %361 : vector<8x32xf32> to vector<8x32xbf16>
    %cst_134 = arith.constant dense<0.000000e+00> : vector<8x4xf32>
    %363 = tpu.matmul %361, %220, %cst_134 {dimension_numbers = #tpu.dot_dimension_numbers<[1], [0], [0], [1], [0, 0, 1, 1], [], []>} : vector<8x32xf32>, vector<32x4xf32>, vector<8x4xf32> -> vector<8x4xf32>
    %cst_135 = arith.constant dense<0xFF800000> : vector<8xf32>
    %364 = vector.multi_reduction <maximumf>, %363, %cst_135 [1] : vector<8x4xf32> to vector<8xf32>
    %365 = vector.shape_cast %364 : vector<8xf32> to vector<8x1xf32>
    %366 = vector.broadcast %365 : vector<8x1xf32> to vector<8x4xf32>
    %367 = arith.cmpf oeq, %363, %366 : vector<8x4xf32>
    %cst_136 = arith.constant 4.000000e+00 : f32
    %368 = vector.broadcast %cst_136 : f32 to vector<8x4xf32>
    %369 = arith.select %367, %9, %368 : vector<8x4xi1>, vector<8x4xf32>
    %cst_137 = arith.constant dense<0x7F800000> : vector<8xf32>
    %370 = vector.multi_reduction <minimumf>, %369, %cst_137 [1] : vector<8x4xf32> to vector<8xf32>
    %371 = vector.shape_cast %370 : vector<8xf32> to vector<8x1xf32>
    %372 = vector.broadcast %371 : vector<8x1xf32> to vector<8x4xf32>
    %373 = arith.cmpf oeq, %9, %372 : vector<8x4xf32>
    %cst_138 = arith.constant -1.000000e+30 : f32
    %374 = vector.broadcast %cst_138 : f32 to vector<8x4xf32>
    %375 = arith.select %373, %374, %363 : vector<8x4xi1>, vector<8x4xf32>
    %cst_139 = arith.constant dense<0xFF800000> : vector<8xf32>
    %376 = vector.multi_reduction <maximumf>, %375, %cst_139 [1] : vector<8x4xf32> to vector<8xf32>
    %377 = vector.shape_cast %376 : vector<8xf32> to vector<8x1xf32>
    %378 = vector.broadcast %377 : vector<8x1xf32> to vector<8x4xf32>
    %379 = arith.cmpf oeq, %375, %378 : vector<8x4xf32>
    %cst_140 = arith.constant 4.000000e+00 : f32
    %380 = vector.broadcast %cst_140 : f32 to vector<8x4xf32>
    %381 = arith.select %379, %9, %380 : vector<8x4xi1>, vector<8x4xf32>
    %cst_141 = arith.constant dense<0x7F800000> : vector<8xf32>
    %382 = vector.multi_reduction <minimumf>, %381, %cst_141 [1] : vector<8x4xf32> to vector<8xf32>
    %383 = vector.shape_cast %382 : vector<8xf32> to vector<8x1xf32>
    %384 = vector.broadcast %383 : vector<8x1xf32> to vector<8x4xf32>
    %385 = arith.cmpf oeq, %9, %384 : vector<8x4xf32>
    %386 = arith.ori %373, %385 : vector<8x4xi1>
    %387 = vector.broadcast %365 : vector<8x1xf32> to vector<8x4xf32>
    %388 = arith.subf %363, %387 : vector<8x4xf32>
    %389 = math.exp %388 : vector<8x4xf32>
    %cst_142 = arith.constant 0.000000e+00 : f32
    %390 = vector.broadcast %cst_142 : f32 to vector<8x4xf32>
    %391 = arith.select %386, %389, %390 : vector<8x4xi1>, vector<8x4xf32>
    %cst_143 = arith.constant dense<0.000000e+00> : vector<8xf32>
    %392 = vector.multi_reduction <add>, %391, %cst_143 [1] : vector<8x4xf32> to vector<8xf32>
    %393 = vector.shape_cast %392 : vector<8xf32> to vector<8x1xf32>
    %394 = vector.broadcast %393 : vector<8x1xf32> to vector<8x4xf32>
    %395 = arith.divf %391, %394 : vector<8x4xf32>
    %cst_144 = arith.constant dense<0.000000e+00> : vector<8x512xf32>
    %396 = tpu.matmul %362, %222, %cst_144 {dimension_numbers = #tpu.dot_dimension_numbers<[1], [0], [0], [1], [0, 0, 1, 1], [], []>} : vector<8x32xbf16>, vector<32x512xbf16>, vector<8x512xf32> -> vector<8x512xf32>
    %397 = vector.extract_strided_slice %396 {offsets = [0, 0], sizes = [8, 256], strides = [1, 1]} : vector<8x512xf32> to vector<8x256xf32>
    %398 = vector.extract_strided_slice %396 {offsets = [0, 256], sizes = [8, 256], strides = [1, 1]} : vector<8x512xf32> to vector<8x256xf32>
    %399 = arith.negf %397 : vector<8x256xf32>
    %400 = math.exp %399 : vector<8x256xf32>
    %cst_145 = arith.constant 1.000000e+00 : f32
    %401 = vector.broadcast %cst_145 : f32 to vector<8x256xf32>
    %402 = arith.addf %401, %400 : vector<8x256xf32>
    %403 = arith.divf %401, %402 : vector<8x256xf32>
    %404 = arith.mulf %397, %403 : vector<8x256xf32>
    %405 = arith.mulf %404, %398 : vector<8x256xf32>
    %cst_146 = arith.constant dense<0.000000e+00> : vector<8x256xf32>
    %406 = tpu.matmul %395, %4, %cst_146 {dimension_numbers = #tpu.dot_dimension_numbers<[1], [0], [0], [1], [0, 0, 1, 1], [], []>} : vector<8x4xf32>, vector<4x256xf32>, vector<8x256xf32> -> vector<8x256xf32>
    %407 = arith.mulf %405, %406 : vector<8x256xf32>
    %408 = arith.truncf %407 : vector<8x256xf32> to vector<8x256xbf16>
    %cst_147 = arith.constant dense<0.000000e+00> : vector<8x32xf32>
    %409 = tpu.matmul %408, %224, %cst_147 {dimension_numbers = #tpu.dot_dimension_numbers<[1], [0], [0], [1], [0, 0, 1, 1], [], []>} : vector<8x256xbf16>, vector<256x32xbf16>, vector<8x32xf32> -> vector<8x32xf32>
    %410 = arith.addf %409, %349 : vector<8x32xf32>
    %c0_148 = arith.constant 0 : index
    %c0_149 = arith.constant 0 : index
    %411 = vector.load %arg5[%c0_148, %c0_149] : memref<1x32xf32, #tpu.memory_space<vmem>>, vector<1x32xf32>
    %412 = arith.mulf %410, %410 : vector<8x32xf32>
    %cst_150 = arith.constant dense<0.000000e+00> : vector<8xf32>
    %413 = vector.multi_reduction <add>, %412, %cst_150 [1] : vector<8x32xf32> to vector<8xf32>
    %414 = vector.shape_cast %413 : vector<8xf32> to vector<8x1xf32>
    %cst_151 = arith.constant 3.200000e+01 : f32
    %415 = vector.broadcast %cst_151 : f32 to vector<8x1xf32>
    %416 = arith.divf %414, %415 : vector<8x1xf32>
    %cst_152 = arith.constant 9.99999974E-6 : f32
    %417 = vector.broadcast %cst_152 : f32 to vector<8x1xf32>
    %418 = arith.addf %416, %417 : vector<8x1xf32>
    %419 = math.rsqrt %418 : vector<8x1xf32>
    %420 = vector.broadcast %419 : vector<8x1xf32> to vector<8x32xf32>
    %421 = arith.mulf %410, %420 : vector<8x32xf32>
    %422 = vector.broadcast %411 : vector<1x32xf32> to vector<8x32xf32>
    %423 = arith.mulf %421, %422 : vector<8x32xf32>
    %c0_153 = arith.constant 0 : index
    %c0_154 = arith.constant 0 : index
    %424 = vector.load %arg13[%c0_153, %c0_154] : memref<8x32xf32, #tpu.memory_space<vmem>>, vector<8x32xf32>
    tpu.vector_store %arg13[%c0_153, %c0_154], %423 {strides = array<i32>} : memref<8x32xf32, #tpu.memory_space<vmem>>, vector<8x32xf32>,
    return
  }
  func.func @transform_0(%arg0: i32) -> (i32, i32) {
    %c0_i32 = arith.constant 0 : i32
    %c0_i32_0 = arith.constant 0 : i32
    %c0_i32_1 = arith.constant 0 : i32
    return %c0_i32, %c0_i32_0 : i32, i32
  }
  func.func @transform_1(%arg0: i32) -> (i32, i32) {
    %c0_i32 = arith.constant 0 : i32
    %c0_i32_0 = arith.constant 0 : i32
    %c0_i32_1 = arith.constant 0 : i32
    return %c0_i32, %c0_i32_0 : i32, i32
  }
  func.func @transform_2(%arg0: i32) -> (i32, i32) {
    %c0_i32 = arith.constant 0 : i32
    %c0_i32_0 = arith.constant 0 : i32
    %c0_i32_1 = arith.constant 0 : i32
    return %c0_i32, %c0_i32_0 : i32, i32
  }
  func.func @transform_3(%arg0: i32) -> (i32, i32) {
    %c0_i32 = arith.constant 0 : i32
    %c0_i32_0 = arith.constant 0 : i32
    %c0_i32_1 = arith.constant 0 : i32
    return %c0_i32, %c0_i32_0 : i32, i32
  }
  func.func @transform_4(%arg0: i32) -> (i32, i32) {
    %c0_i32 = arith.constant 0 : i32
    %c0_i32_0 = arith.constant 0 : i32
    %c0_i32_1 = arith.constant 0 : i32
    return %c0_i32, %c0_i32_0 : i32, i32
  }
  func.func @transform_5(%arg0: i32) -> (i32, i32, i32) {
    %c0_i32 = arith.constant 0 : i32
    %c0_i32_0 = arith.constant 0 : i32
    %c0_i32_1 = arith.constant 0 : i32
    %c0_i32_2 = arith.constant 0 : i32
    return %c0_i32, %c0_i32_0, %c0_i32_1 : i32, i32, i32
  }
  func.func @transform_6(%arg0: i32) -> (i32, i32, i32) {
    %c0_i32 = arith.constant 0 : i32
    %c0_i32_0 = arith.constant 0 : i32
    %c0_i32_1 = arith.constant 0 : i32
    %c0_i32_2 = arith.constant 0 : i32
    return %c0_i32, %c0_i32_0, %c0_i32_1 : i32, i32, i32
  }
  func.func @transform_7(%arg0: i32) -> (i32, i32, i32) {
    %c0_i32 = arith.constant 0 : i32
    %c0_i32_0 = arith.constant 0 : i32
    %c0_i32_1 = arith.constant 0 : i32
    %c0_i32_2 = arith.constant 0 : i32
    return %c0_i32, %c0_i32_0, %c0_i32_1 : i32, i32, i32
  }
  func.func @transform_8(%arg0: i32) -> (i32, i32, i32) {
    %c0_i32 = arith.constant 0 : i32
    %c0_i32_0 = arith.constant 0 : i32
    %c0_i32_1 = arith.constant 0 : i32
    %c0_i32_2 = arith.constant 0 : i32
    return %c0_i32, %c0_i32_0, %c0_i32_1 : i32, i32, i32
  }
  func.func @transform_9(%arg0: i32) -> (i32, i32, i32) {
    %c0_i32 = arith.constant 0 : i32
    %c0_i32_0 = arith.constant 0 : i32
    %c0_i32_1 = arith.constant 0 : i32
    %c0_i32_2 = arith.constant 0 : i32
    return %c0_i32, %c0_i32_0, %c0_i32_1 : i32, i32, i32
  }
  func.func @transform_10(%arg0: i32) -> (i32, i32, i32) {
    %c0_i32 = arith.constant 0 : i32
    %c0_i32_0 = arith.constant 0 : i32
    %c0_i32_1 = arith.constant 0 : i32
    %c0_i32_2 = arith.constant 0 : i32
    return %c0_i32, %c0_i32_0, %c0_i32_1 : i32, i32, i32
  }
  func.func @transform_11(%arg0: i32) -> (i32, i32, i32) {
    %c0_i32 = arith.constant 0 : i32
    %c0_i32_0 = arith.constant 0 : i32
    %c0_i32_1 = arith.constant 0 : i32
    %c0_i32_2 = arith.constant 0 : i32
    return %c0_i32, %c0_i32_0, %c0_i32_1 : i32, i32, i32
  }
  func.func @transform_12(%arg0: i32) -> (i32, i32) {
    %c0_i32 = arith.constant 0 : i32
    %c0_i32_0 = arith.constant 0 : i32
    %c0_i32_1 = arith.constant 0 : i32
    return %c0_i32, %c0_i32_0 : i32, i32
  }
}

</mosaic_0001>

<bundles_post_ra>
// kernel: tile.14
= control target key start
LH: loop header
LB: loop body
LE: loop exit
PB: predicated region body
PF: predicated region fallthrough
CT: control target
= control target key end

     0   :  { %vm36_vm0 = vcmask 1047556   ;;  %s81_s22 = smov 8   ;;  %s82_s23 = smov 16   ;;  %vm38_vm1 = vcmask 64512   ;;  %vm48_vm2 = vcmask 261312   ;;  %vm58_vm3 = vcmask 195712   ;;  %s133_s0 = inlined_call_operand.vmem [shape: f32[8,4,8], index: 0, kind: input, shape index: {}]   ;;  %s134_s1 = inlined_call_operand.vmem [shape: f32[8,32], index: 1, kind: output, shape index: {}]  }
   0x1   :  { %v70_v0 = vld [vmem:[%s133_s0 + $0x1c] sm:$0xf]  ;;  %v71_v1 = vld [vmem:[%s133_s0 + $0x18] sm:$0xf]  ;;  %v72_v2 = vld [vmem:[%s133_s0 + $0x14] sm:$0xf] }
   0x2   :  { %7 = vst [vmem:[#allocation0 + $0x38] sm:$0xf] %v70_v0  ;;  %v73_v3 = vld [vmem:[%s133_s0 + $0x10] sm:$0xf]  ;;  %v74_v4 = vld [vmem:[%s133_s0 + $0xc] sm:$0xf] }
   0x3   :  { %11 = vst [vmem:[#allocation0 + $0x30] sm:$0xf] %v71_v1  ;;  %v75_v5 = vld [vmem:[%s133_s0 + $0x8] sm:$0xf]  ;;  %v76_v6 = vld [vmem:[%s133_s0 + $0x4] sm:$0xf] }
   0x4   :  { %15 = vst [vmem:[#allocation0 + $0x28] sm:$0xf] %v72_v2  ;;  %v32_v7 = vld [vmem:[%s133_s0] sm:$0xf]  ;;  %s80_s0 = smov 24   ;;  %vm68_vm4 = vcmask 130112  }
   0x5   :  { %19 = vst [vmem:[#allocation0 + $0x20] sm:$0xf] %v73_v3 }
   0x6   :  { %23 = vst [vmem:[#allocation0 + $0x18] sm:$0xf] %v74_v4 }
   0x7   :  { %27 = vst [vmem:[#allocation0 + $0x10] sm:$0xf] %v75_v5 }
   0x8   :  { %31 = vst [vmem:[#allocation0 + $0x8] sm:$0xf] %v76_v6 }
   0x9   :  { %33 = vst [vmem:[#allocation0] sm:$0xf] %v32_v7 }
   0xc   :  { %v43_v8 = vld [vmem:[#allocation0 + $0x3] ss:$8 sm:$0xf0]   ;;  %v63_v9 = vld [vmem:[#allocation0 + $0x1] ss:$8 sm:$0xf0]  }
   0xd   :  { %v53_v15 = vld [vmem:[#allocation0 + $0x2] ss:$8 sm:$0xf0]   ;;  %v35_v18 = vld [vmem:[#allocation0] ss:$8 sm:$0xf0]  }
  0x10   :  { %v41_v10 = vld [vmem:[#allocation0 + $0x3] ss:$8 sm:$0xf]   ;;  %v61_v12 = vld [vmem:[#allocation0 + $0x1] ss:$8 sm:$0xf]  }
  0x11   :  { %v45_v11 = vsel %vm36_vm0, %v43_v8, %v41_v10  ;;  %v65_v13 = vsel %vm36_vm0, %v63_v9, %v61_v12  ;;  %v51_v14 = vld [vmem:[#allocation0 + $0x2] ss:$8 sm:$0xf]   ;;  %v34_v17 = vld [vmem:[#allocation0] ss:$8 sm:$0xf]  }
  0x12   :  { %46 = vrot.lane.b32.xlu0 %v45_v11, %s80_s0  ;;  %66 = vrot.lane.b32.xlu1 %v65_v13, %s81_s22  ;;  %v55_v16 = vsel %vm36_vm0, %v53_v15, %v51_v14  ;;  %v37_v19 = vsel %vm36_vm0, %v35_v18, %v34_v17 }
  0x13   :  { %39 = vst.msk [vmem:[%s134_s1] sm:$0xff] %vm38_vm1, %v37_v19  }
  0x1a   :  { %56 = vrot.lane.b32.xlu0 %v55_v16, %s82_s23 }
  0x84   :  { %v47_v20 = vpop.permute.xlu0 %46   ;;  %v67_v21 = vpop.permute.xlu1 %66  }
  0x85   :  { %49 = vst.msk [vmem:[%s134_s1] sm:$0xff] %vm48_vm2, %v47_v20  }
  0x8c   :  { %v57_v22 = vpop.permute.xlu0 %56  }
  0x8d   :  { %59 = vst.msk [vmem:[%s134_s1] sm:$0xff] %vm58_vm3, %v57_v22  }
  0x8e   :  { %69 = vst.msk [vmem:[%s134_s1] sm:$0xff] %vm68_vm4, %v67_v21  }

// kernel: mixtral_forward.1
= control target key start
LH: loop header
LB: loop body
LE: loop exit
PB: predicated region body
PF: predicated region fallthrough
CT: control target
= control target key end

     0   :  { %vm109_vm0 = vcmask 261120   ;;  %s2994_s0 = inlined_call_operand.vmem [shape: f32[8,32], index: 0, kind: input, shape index: {}]   ;;  %s2995_s1 = inlined_call_operand.vmem [shape: f32[8,32], index: 1, kind: input, shape index: {}]   ;;  %s2996_s2 = inlined_call_operand.vmem [shape: f32[8,32], index: 2, kind: input, shape index: {}]   ;;  %s2997_s3 = inlined_call_operand.vmem [shape: f32[4,256], index: 3, kind: input, shape index: {}]   ;;  %s2998_s4 = inlined_call_operand.vmem [shape: f32[1,32], index: 4, kind: input, shape index: {}]   ;;  %s2999_s5 = inlined_call_operand.vmem [shape: f32[2,1,32], index: 5, kind: input, shape index: {}]   ;;  %s3000_s6 = inlined_call_operand.vmem [shape: bf16[2,32,128], index: 6, kind: input, shape index: {}]   ;;  %s3001_s7 = inlined_call_operand.vmem [shape: bf16[2,32,32], index: 7, kind: input, shape index: {}]   ;;  %s3002_s8 = inlined_call_operand.vmem [shape: f32[2,1,32], index: 8, kind: input, shape index: {}]   ;;  %s3003_s9 = inlined_call_operand.vmem [shape: f32[2,32,4], index: 9, kind: input, shape index: {}]   ;;  %s3004_s10 = inlined_call_operand.vmem [shape: bf16[2,32,512], index: 10, kind: input, shape index: {}]   ;;  %s3005_s11 = inlined_call_operand.vmem [shape: bf16[2,256,32], index: 11, kind: input, shape index: {}]   ;;  %s3006_s12 = inlined_call_operand.hbm [shape: f32[8,32], index: 12, kind: output, shape index: {}]  }
   0x1   :  { %v2464_v0 = vld [vmem:[%s2994_s0] sm:$0xff] }
   0x2   :  { %v108_v1 = vmul.f32 %v2464_v0, %v2464_v0 }
   0x3   :  { %17 = vsyncpa [#allocation3], 0  ;;  %v2385_v3 = vmov 32.0   ;;  %v2224_v7 = vld [vmem:[%s3000_s6 + $0x8] sm:$0xff]  ;;  %v2223_v9 = vld [vmem:[%s3000_s6] sm:$0xff]  ;;  %s2386_s30 = smov 80   ;;  %v46_v47 = vlaneseq }
   0x4   :  { %v110_v2 = vsel %vm109_vm0, %v108_v1, 0.0  ;;  %2291 = vrcp.f32 %v2385_v3  ;;  %159 = vmatpush.bf16.msra.mxu0 %v2224_v7  ;;  %v44_v11 = vld [vmem:[%s2996_s2] sm:$0xff]  ;;  %s2387_s13 = smov 64   ;;  %s2388_s14 = smov 32   ;;  %vm256_vm5 = vcmask 1043456   ;;  %vm195_vm6 = vcmask 64512  }
   0x5   :  { %111 = vadd.xlane.f32.xlu0 %v110_v2  ;;  %v2481_v12 = vld [vmem:[%s2995_s1] sm:$0xff]  ;;  %168 = vrot.lane.b32.xlu2 %v44_v11, %s2388_s14  ;;  %s2389_s15 = smov 112   ;;  %s2390_s16 = smov 96   ;;  %v47_v48 = vshrl.u32 %v46_v47, 7  ;;  %v2519_v49 = vand.u32 127, %v46_v47 }
   0x6   :  { %178 = vrot.lane.b32.xlu1 %v2481_v12, %s2387_s13  ;;  %v2286_v23 = vld [vmem:[%s2999_s5] ss:$0 sm:$0xff]  ;;  %s2391_s17 = smov 120   ;;  %s2392_s20 = smov 104  }
   0x7   :  { %vm2522_vm7 = vcmp.ge.s32.totalorder %v47_v48, %v2519_v49  ;;  %s2393_s21 = smov 56   ;;  %s2394_s24 = smov 24  }
   0x8   :  { %160 = vmatpush.bf16.msra.mxu0 %v2223_v9 }
   0xa   :  { %v2292_v4 = vpop.eup %2291 }
   0xb   :  { %v114_v5 = vmul.f32 32.0, %v2292_v4  ;;  %vm118_vm1 = vweird.f32 %v2292_v4 }
   0xd   :  { %v115_v6 = vsub.f32 1.0, %v114_v5 }
   0xf   :  { %v116_v8 = vmul.f32 %v2292_v4, %v115_v6 }
  0x11   :  { %v117_v10 = vadd.f32 %v2292_v4, %v116_v8 }
  0x13   :  { %v2483_v13 = vsel %vm118_vm1, %v2292_v4, %v117_v10 }
  0x19   :  { %182 = vrot.lane.b32.xlu0 %v44_v11, %s2386_s30  ;;  %v58_v11 = vld [vmem:[%s3001_s7] sm:$0xf] }
  0x5f   :  { %v2500_v34 = vpop.permute.xlu2 %168 }
  0x78   :  { %v112_v14 = vpop.xlane.xlu0 %111  ;;  %v2506_v37 = vpop.permute.xlu1 %178 }
  0x79   :  { %v120_v15 = vmul.f32 %v2483_v13, %v112_v14  ;;  %v365_v14 = vsel %vm256_vm5, %v58_v11, 0 }
  0x7b   :  { %v121_v16 = vadd.f32 1e-05, %v120_v15 }
  0x7d   :  { %2293 = vrsqrt.f32 %v121_v16  ;;  %vm128_vm3 = vweird.f32 %v121_v16 }
  0x83   :  { %v2294_v17 = vpop.eup %2293 }
  0x84   :  { %v123_v18 = vmul.f32 %v2294_v17, %v121_v16  ;;  %vm129_vm2 = vweird.f32 %v2294_v17 }
  0x85   :  { %vm130_vm4 = vmor %vm128_vm3, %vm129_vm2 }
  0x86   :  { %v124_v19 = vmul.f32 %v2294_v17, %v123_v18 }
  0x88   :  { %v125_v20 = vmul.f32 0.5, %v124_v19 }
  0x8a   :  { %v126_v21 = vsub.f32 1.5, %v125_v20 }
  0x8b   :  { %v2494_v28 = vpop.permute.xlu0 %182 }
  0x8c   :  { %v127_v22 = vmul.f32 %v2294_v17, %v126_v21 }
  0x8e   :  { %v131_v24 = vsel %vm130_vm4, %v2294_v17, %v127_v22 }
  0x8f   :  { %v132_v25 = vmul.f32 %v131_v24, %v2464_v0 }
  0x91   :  { %v136_v26 = vmul.f32 %v2286_v23, %v132_v25 }
  0x93   :  { %v137_v27 = vpack.c.bf16 %v136_v26, %v136_v26 }
  0x95   :  { %1913 = vmatmul.msk.bf16.vlgmr.msra.gmra.mxu0 %vm109_vm0, %v137_v27 }
 0x112   :  { %v162_v29 = vpop.f32.mrf.mxu0 }
 0x113   :  { %v185_v30 = vmul.f32 %v2494_v28, %v162_v29  ;;  %v191_v31 = vpack.c.bf16 %v162_v29, %v162_v29  ;;  %v171_v36 = vmul.f32 %v2500_v34, %v162_v29  ;;  %v181_v38 = vmul.f32 %v2506_v37, %v162_v29 }
 0x114   :  { %v166_v43 = vmul.f32 %v162_v29, %v2481_v12 }
 0x115   :  { %187 = vrot.lane.b32.xlu1 %v185_v30, %s2389_s15  ;;  %v249_v32 = vunpack.c.l.b16 %v191_v31 }
 0x117   :  { %v2498_v33 = vpack.c.b16 %v249_v32, %v249_v32 }
 0x119   :  { %251 = vrot.lane.b32.xlu0 %v2498_v33, %s2388_s14 }
 0x11a   :  { %v164_v35 = vpop.f32.mrf.mxu0 }
 0x11d   :  { %173 = vrot.lane.b32.xlu1 %v171_v36, %s2390_s16 }
 0x187   :  { %v188_v39 = vpop.permute.xlu1 %187 }
 0x188   :  { %v2509_v40 = vadd.f32 %v188_v39, %v181_v38 }
 0x18a   :  { %193 = vrot.lane.b32.xlu2 %v2509_v40, %s2387_s13 }
 0x18b   :  { %v252_v41 = vpop.permute.xlu0 %251 }
 0x18c   :  { %v258_v42 = vsel %vm256_vm5, %v252_v41, 0 }
 0x18d   :  { %267 = vmatpush.bf16.msra.mxu2 %v258_v42  ;;  %335 = vmatpush.bf16.msrb.mxu0 %v258_v42 }
 0x18f   :  { %v174_v44 = vpop.permute.xlu1 %173 }
 0x190   :  { %v176_v45 = vadd.f32 %v174_v44, %v166_v43 }
 0x192   :  { %274 = vrot.lane.b32.xlu0 %v176_v45, %s2391_s17 }
 0x1e4   :  { %v194_v46 = vpop.permute.xlu2 %193 }
 0x1e5   :  { %1914 = vmatpush.xpose.msk.msra.mxu1 %vm195_vm6, %v194_v46  ;;  %1917 = vmatpush.xpose.msk.msrb.mxu2 %vm195_vm6, %v194_v46 }
 0x1e8   :  { %1915 = vmatmul.msk.f32.vlgmr.msra.gmra.mxu1 %vm195_vm6, %v176_v45 }
 0x204   :  { %v275_v10 = vpop.permute.xlu0 %274 }
 0x265   :  { %v218_v50 = vpop.f32.mrf.mxu1 }
 0x266   :  { %v221_v52 = vmul.f32 0.35355338, %v218_v50  ;;  %v59_v50 = vld [vmem:[%s3001_s7 + $0x4] sm:$0xf] }
 0x268   :  { %v222_v53 = vsel %vm2522_vm7, %v221_v52, -1e+30  ;;  %v346_v52 = vsel %vm256_vm5, %v59_v50, 0  ;;  %v61_v50 = vld [vmem:[%s3001_s7 + $0xc] sm:$0xf] }
 0x269   :  { %v223_v54 = vsel %vm195_vm6, %v222_v53, -inf  ;;  %355 = vmatpush.bf16.msra.mxu3 %v346_v52  ;;  %v549_v52 = vsel %vm256_vm5, %v61_v50, 0 }
 0x26a   :  { %224 = vmax.xlane.f32.xlu2 %v223_v54 }
 0x2dd   :  { %v225_v55 = vpop.xlane.xlu2 %224 }
 0x2de   :  { %v226_v56 = vsub.f32 %v222_v53, %v225_v55 }
 0x2e0   :  { %v227_v57 = vmul.f32 1.442695, %v226_v56 }
 0x2e2   :  { %2295 = vpow2.f32 %v227_v57 }
 0x2e8   :  { %v2296_v58 = vpop.eup %2295 }
 0x2e9   :  { %v229_v59 = vsel %vm195_vm6, %v2296_v58, 0.0 }
 0x2ea   :  { %230 = vadd.xlane.f32.xlu1 %v229_v59 }
 0x303   :  { %380 = vrot.lane.b32.xlu1 %v176_v45, %s2389_s15 }
 0x35d   :  { %v231_v60 = vpop.xlane.xlu1 %230 }
 0x35e   :  { %2297 = vrcp.f32 %v231_v60  ;;  %v243_v1 = vand.u32 2147483648, %v231_v60  ;;  %v241_v3 = vand.u32 2147483647, %v231_v60  ;;  %vm237_vm9 = vweird.f32 %v231_v60 }
 0x360   :  { %v244_v5 = vor.u32 1.1754944e-38, %v243_v1  ;;  %vm242_vm11 = vcmp.eq.f32.partialorder %v241_v3, 8.507059e+37 }
 0x364   :  { %v2298_v61 = vpop.eup %2297 }
 0x365   :  { %v233_v62 = vmul.f32 %v2298_v61, %v231_v60  ;;  %vm238_vm8 = vweird.f32 %v2298_v61 }
 0x366   :  { %vm239_vm10 = vmor %vm237_vm9, %vm238_vm8 }
 0x367   :  { %v234_v63 = vsub.f32 1.0, %v233_v62 }
 0x369   :  { %v235_v2 = vmul.f32 %v2298_v61, %v234_v63 }
 0x36b   :  { %v236_v4 = vadd.f32 %v2298_v61, %v235_v2 }
 0x36d   :  { %v240_v6 = vsel %vm239_vm10, %v2298_v61, %v236_v4 }
 0x36e   :  { %v245_v7 = vsel %vm242_vm11, %v244_v5, %v240_v6 }
 0x36f   :  { %v246_v8 = vmul.f32 %v2296_v58, %v245_v7 }
 0x371   :  { %v247_v9 = vpack.c.bf16 %v246_v8, %v246_v8 }
 0x373   :  { %1916 = vmatmul.msk.bf16.vlgmr.msra.gmra.mxu2 %vm195_vm6, %v247_v9 }
 0x374   :  { %374 = vmatpush.bf16.msra.mxu2 %v365_v14 }
 0x375   :  { %v381_v47 = vpop.permute.xlu1 %380 }
 0x383   :  { %1918 = vmatmul.msk.f32.vlgmr.msrb.gmra.mxu2 %vm195_vm6, %v275_v10 }
 0x3f6   :  { %v269_v15 = vpop.f32.mrf.mxu2 }
 0x3f7   :  { %v273_v16 = vpack.c.bf16 %v269_v15, %v269_v15 }
 0x3f9   :  { %1921 = vmatmul.msk.bf16.vlgmr.msra.gmra.mxu2 %vm195_vm6, %v273_v16 }
 0x3fe   :  { %v271_v17 = vpop.f32.mrf.mxu2 }
 0x406   :  { %v295_v18 = vpop.f32.mrf.mxu2 }
 0x407   :  { %v298_v19 = vmul.f32 0.35355338, %v295_v18 }
 0x409   :  { %v299_v20 = vsel %vm2522_vm7, %v298_v19, -1e+30 }
 0x40a   :  { %v300_v21 = vsel %vm195_vm6, %v299_v20, -inf }
 0x40b   :  { %301 = vmax.xlane.f32.xlu0 %v300_v21 }
 0x41f   :  { %477 = vrot.lane.b32.xlu0 %v176_v45, %s2392_s20 }
 0x47c   :  { %v2542_v22 = vpop.f32.mrf.mxu2 }
 0x47e   :  { %v302_v23 = vpop.xlane.xlu0 %301 }
 0x47f   :  { %v303_v24 = vsub.f32 %v299_v20, %v302_v23 }
 0x481   :  { %v304_v25 = vmul.f32 1.442695, %v303_v24 }
 0x483   :  { %2299 = vpow2.f32 %v304_v25 }
 0x484   :  { %v378_v26 = vpop.f32.mrf.mxu2 }
 0x489   :  { %v2300_v27 = vpop.eup %2299 }
 0x48a   :  { %v306_v29 = vsel %vm195_vm6, %v2300_v27, 0.0 }
 0x48b   :  { %307 = vadd.xlane.f32.xlu2 %v306_v29 }
 0x491   :  { %v478_v48 = vpop.permute.xlu0 %477 }
 0x4a3   :  { %382 = vrot.lane.b32.xlu2 %v2509_v40, %s2393_s21 }
 0x4fe   :  { %v308_v30 = vpop.xlane.xlu2 %307 }
 0x4ff   :  { %2301 = vrcp.f32 %v308_v30  ;;  %v320_v38 = vand.u32 2147483648, %v308_v30  ;;  %v318_v41 = vand.u32 2147483647, %v308_v30  ;;  %vm314_vm13 = vweird.f32 %v308_v30 }
 0x501   :  { %v321_v43 = vor.u32 1.1754944e-38, %v320_v38  ;;  %vm319_vm15 = vcmp.eq.f32.partialorder %v318_v41, 8.507059e+37 }
 0x505   :  { %v2302_v31 = vpop.eup %2301 }
 0x506   :  { %v310_v32 = vmul.f32 %v2302_v31, %v308_v30  ;;  %v383_v35 = vpop.permute.xlu2 %382  ;;  %vm315_vm12 = vweird.f32 %v2302_v31 }
 0x507   :  { %1922 = vmatpush.xpose.msk.msra.mxu0 %vm195_vm6, %v383_v35  ;;  %vm316_vm14 = vmor %vm314_vm13, %vm315_vm12 }
 0x508   :  { %v311_v36 = vsub.f32 1.0, %v310_v32 }
 0x50a   :  { %v312_v39 = vmul.f32 %v2302_v31, %v311_v36 }
 0x50c   :  { %v313_v42 = vadd.f32 %v2302_v31, %v312_v39 }
 0x50e   :  { %v317_v44 = vsel %vm316_vm14, %v2302_v31, %v313_v42 }
 0x50f   :  { %v322_v45 = vsel %vm319_vm15, %v321_v43, %v317_v44  ;;  %vm611_vm15 = vcmask 31744  }
 0x510   :  { %v323_v40 = vmul.f32 %v2300_v27, %v322_v45 }
 0x512   :  { %v324_v46 = vpack.c.bf16 %v323_v40, %v323_v40 }
 0x514   :  { %1919 = vmatmul.msk.bf16.vlgmr.msrb.gmra.mxu0 %vm195_vm6, %v324_v46 }
 0x515   :  { %1926 = vmatpush.xpose.msk.msrb.mxu0 %vm195_vm6, %v383_v35 }
 0x524   :  { %1923 = vmatmul.msk.f32.vlgmr.msra.gmra.mxu0 %vm195_vm6, %v381_v47  ;;  %v60_v47 = vld [vmem:[%s3001_s7 + $0x8] sm:$0xf] }
 0x525   :  { %558 = vmatpush.bf16.msra.mxu0 %v549_v52 }
 0x52c   :  { %1927 = vmatmul.msk.f32.vlgmr.msrb.gmra.mxu0 %vm195_vm6, %v478_v48  ;;  %v461_v48 = vsel %vm256_vm5, %v60_v47, 0  ;;  %v2287_v47 = vld [vmem:[%s3002_s8] ss:$0 sm:$0xff] }
 0x52d   :  { %470 = vmatpush.bf16.msrb.mxu3 %v461_v48 }
 0x591   :  { %v337_v53 = vpop.f32.mrf.mxu0 }
 0x592   :  { %v341_v54 = vpack.c.bf16 %v337_v53, %v337_v53 }
 0x594   :  { %1920 = vmatmul.msk.bf16.vlgmr.msra.gmra.mxu3 %vm195_vm6, %v341_v54 }
 0x599   :  { %v339_v55 = vpop.f32.mrf.mxu0 }
 0x5a1   :  { %v405_v56 = vpop.f32.mrf.mxu0 }
 0x5a2   :  { %v408_v57 = vmul.f32 0.35355338, %v405_v56 }
 0x5a4   :  { %v409_v58 = vsel %vm2522_vm7, %v408_v57, -1e+30 }
 0x5a5   :  { %v410_v59 = vsel %vm195_vm6, %v409_v58, -inf }
 0x5a6   :  { %411 = vmax.xlane.f32.xlu2 %v410_v59 }
 0x5a9   :  { %v498_v60 = vpop.f32.mrf.mxu0 }
 0x5aa   :  { %v501_v61 = vmul.f32 0.35355338, %v498_v60 }
 0x5ac   :  { %v502_v62 = vsel %vm2522_vm7, %v501_v61, -1e+30 }
 0x5ad   :  { %v503_v63 = vsel %vm195_vm6, %v502_v62, -inf }
 0x5ae   :  { %504 = vmax.xlane.f32.xlu1 %v503_v63 }
 0x5c7   :  { %435 = vrot.lane.b32.xlu1 %v2498_v33, %s2394_s24 }
 0x617   :  { %v2565_v1 = vpop.f32.mrf.mxu3 }
 0x618   :  { %v377_v60 = vadd.f32 %v2542_v22, %v2565_v1  ;;  %v1949_v22 = vld [vmem:[%s3004_s10 + $0x20] sm:$0xf] }
 0x619   :  { %v412_v2 = vpop.xlane.xlu2 %411 }
 0x61a   :  { %v413_v3 = vsub.f32 %v409_v58, %v412_v2 }
 0x61c   :  { %v414_v4 = vmul.f32 1.442695, %v413_v3 }
 0x61e   :  { %2303 = vpow2.f32 %v414_v4 }
 0x61f   :  { %v359_v5 = vpop.f32.mrf.mxu3 }
 0x621   :  { %v505_v6 = vpop.xlane.xlu1 %504 }
 0x622   :  { %v506_v7 = vsub.f32 %v502_v62, %v505_v6 }
 0x624   :  { %v2304_v8 = vpop.eup %2303  ;;  %v507_v9 = vmul.f32 1.442695, %v506_v7  ;;  %v66_v7 = vld [vmem:[%s3003_s9 + $0x18] sm:$0xff] }
 0x625   :  { %v416_v10 = vsel %vm195_vm6, %v2304_v8, 0.0 }
 0x626   :  { %2305 = vpow2.f32 %v507_v9  ;;  %417 = vadd.xlane.f32.xlu0 %v416_v10  ;;  %v2232_v9 = vld [vmem:[%s3004_s10 + $0x34] sm:$0xf0]  ;;  %v2230_v10 = vld [vmem:[%s3004_s10 + $0x2c] sm:$0xf] }
 0x62c   :  { %v2306_v11 = vpop.eup %2305 }
 0x62d   :  { %v509_v14 = vsel %vm195_vm6, %v2306_v11, 0.0 }
 0x62e   :  { %510 = vadd.xlane.f32.xlu2 %v509_v14 }
 0x639   :  { %v436_v33 = vpop.permute.xlu1 %435 }
 0x63a   :  { %v441_v15 = vsel %vm256_vm5, %v436_v33, 0  ;;  %v1959_v33 = vld [vmem:[%s3004_s10 + $0x38] sm:$0xf0] }
 0x63b   :  { %450 = vmatpush.bf16.msrb.mxu1 %v441_v15  ;;  %538 = vmatpush.bf16.msrb.mxu2 %v441_v15  ;;  %v1962_v15 = vor.u32 %v2230_v10, %v1959_v33 }
 0x63d   :  { %742 = vmatpush.bf16.msrb.mxu0 %v1962_v15 }
 0x63f   :  { %603 = vmatpush.msra.mxu1 %v66_v7 }
 0x699   :  { %v418_v16 = vpop.xlane.xlu0 %417 }
 0x69a   :  { %2307 = vrcp.f32 %v418_v16  ;;  %v430_v21 = vand.u32 2147483648, %v418_v16  ;;  %v428_v24 = vand.u32 2147483647, %v418_v16  ;;  %vm424_vm2 = vweird.f32 %v418_v16 }
 0x69c   :  { %v431_v27 = vor.u32 1.1754944e-38, %v430_v21  ;;  %vm429_vm4 = vcmp.eq.f32.partialorder %v428_v24, 8.507059e+37  ;;  %v1941_v21 = vld [vmem:[%s3004_s10 + $0x8] sm:$0xf] }
 0x6a0   :  { %v2308_v17 = vpop.eup %2307 }
 0x6a1   :  { %v420_v18 = vmul.f32 %v2308_v17, %v418_v16  ;;  %v511_v19 = vpop.xlane.xlu2 %510  ;;  %vm425_vm1 = vweird.f32 %v2308_v17  ;;  %v64_v16 = vld [vmem:[%s3003_s9 + $0x8] sm:$0xff] }
 0x6a2   :  { %2309 = vrcp.f32 %v511_v19  ;;  %vm426_vm3 = vmor %vm424_vm2, %vm425_vm1  ;;  %v523_v36 = vand.u32 2147483648, %v511_v19  ;;  %v521_v39 = vand.u32 2147483647, %v511_v19  ;;  %vm517_vm9 = vweird.f32 %v511_v19 }
 0x6a3   :  { %v421_v20 = vsub.f32 1.0, %v420_v18  ;;  %v2227_v18 = vld [vmem:[%s3004_s10 + $0xc] sm:$0xf0] }
 0x6a4   :  { %v524_v43 = vor.u32 1.1754944e-38, %v523_v36  ;;  %vm522_vm11 = vcmp.eq.f32.partialorder %v521_v39, 8.507059e+37 }
 0x6a5   :  { %v422_v23 = vmul.f32 %v2308_v17, %v421_v20 }
 0x6a7   :  { %v423_v25 = vadd.f32 %v2308_v17, %v422_v23  ;;  %v2228_v23 = vld [vmem:[%s3004_s10 + $0x14] sm:$0xf0] }
 0x6a8   :  { %v2310_v26 = vpop.eup %2309  ;;  %v1942_v24 = vor.u32 %v2228_v23, %v1941_v21 }
 0x6a9   :  { %v513_v29 = vmul.f32 %v2310_v26, %v511_v19  ;;  %v427_v30 = vsel %vm426_vm3, %v2308_v17, %v423_v25  ;;  %vm518_vm8 = vweird.f32 %v2310_v26  ;;  %v1933_v17 = vld [vmem:[%s3004_s10] sm:$0xf]  ;;  %v2226_v25 = vld [vmem:[%s3004_s10 + $0xc] sm:$0xf] }
 0x6aa   :  { %v432_v31 = vsel %vm429_vm4, %v431_v27, %v427_v30  ;;  %vm519_vm10 = vmor %vm517_vm9, %vm518_vm8  ;;  %v63_v19 = vld [vmem:[%s3003_s9] sm:$0xff]  ;;  %v1934_v20 = vor.u32 %v2227_v18, %v1933_v17  ;;  %v1951_v30 = vld [vmem:[%s3004_s10 + $0x30] sm:$0xf0] }
 0x6ab   :  { %v514_v32 = vsub.f32 1.0, %v513_v29  ;;  %v433_v35 = vmul.f32 %v2304_v8, %v432_v31  ;;  %v1957_v8 = vld [vmem:[%s3004_s10 + $0x28] sm:$0xf]  ;;  %v2229_v27 = vld [vmem:[%s3004_s10 + $0x24] sm:$0xf] }
 0x6ac   :  { %v1958_v14 = vor.u32 %v2232_v9, %v1957_v8  ;;  %v1954_v31 = vor.u32 %v2229_v27, %v1951_v30 }
 0x6ad   :  { %v515_v38 = vmul.f32 %v2310_v26, %v514_v32  ;;  %v434_v41 = vpack.c.bf16 %v433_v35, %v433_v35  ;;  %v2225_v32 = vld [vmem:[%s3004_s10 + $0x4] sm:$0xf]  ;;  %v1935_v35 = vld [vmem:[%s3004_s10 + $0x10] sm:$0xf0] }
 0x6ae   :  { %729 = vmatpush.bf16.msra.mxu2 %v1958_v14  ;;  %v1938_v36 = vor.u32 %v2225_v32, %v1935_v35  ;;  %v2669_v35 = vcvt.s32.f32 %v2519_v49 }
 0x6af   :  { %v516_v42 = vadd.f32 %v2310_v26, %v515_v38  ;;  %1924 = vmatmul.msk.bf16.vlgmr.msrb.gmra.mxu1 %vm195_vm6, %v434_v41 }
 0x6b1   :  { %v520_v44 = vsel %vm519_vm10, %v2310_v26, %v516_v42  ;;  %v1943_v26 = vld [vmem:[%s3004_s10 + $0x18] sm:$0xf0] }
 0x6b2   :  { %v525_v45 = vsel %vm522_vm11, %v524_v43, %v520_v44  ;;  %v1946_v29 = vor.u32 %v2226_v25, %v1943_v26  ;;  %730 = vmatpush.bf16.msra.mxu2 %v1942_v24 }
 0x6b3   :  { %v526_v40 = vmul.f32 %v2306_v11, %v525_v45  ;;  %v65_v11 = vld [vmem:[%s3003_s9 + $0x10] sm:$0xff] }
 0x6b4   :  { %604 = vmatpush.msra.mxu1 %v65_v11  ;;  %743 = vmatpush.bf16.msrb.mxu0 %v1946_v29 }
 0x6b5   :  { %v527_v46 = vpack.c.bf16 %v526_v40, %v526_v40 }
 0x6b6   :  { %605 = vmatpush.msra.mxu1 %v64_v16 }
 0x6b7   :  { %1928 = vmatmul.msk.bf16.vlgmr.msrb.gmra.mxu2 %vm195_vm6, %v527_v46 }
 0x6b8   :  { %606 = vmatpush.msra.mxu1 %v63_v19 }
 0x6ba   :  { %716 = vmatpush.bf16.msrb.mxu1 %v1954_v31 }
 0x6be   :  { %717 = vmatpush.bf16.msrb.mxu1 %v1938_v36 }
 0x72c   :  { %v452_v53 = vpop.f32.mrf.mxu1 }
 0x72d   :  { %v456_v54 = vpack.c.bf16 %v452_v53, %v452_v53 }
 0x72f   :  { %1925 = vmatmul.msk.bf16.vlgmr.msrb.gmra.mxu3 %vm195_vm6, %v456_v54 }
 0x734   :  { %v454_v55 = vpop.f32.mrf.mxu1 }
 0x73a   :  { %v540_v56 = vpop.f32.mrf.mxu2 }
 0x73b   :  { %v544_v57 = vpack.c.bf16 %v540_v56, %v540_v56 }
 0x73d   :  { %1929 = vmatmul.msk.bf16.vlgmr.msra.gmra.mxu0 %vm195_vm6, %v544_v57 }
 0x742   :  { %v542_v58 = vpop.f32.mrf.mxu2 }
 0x7b2   :  { %v472_v59 = vpop.f32.mrf.mxu3 }
 0x7b3   :  { %v476_v61 = vadd.f32 %v472_v59, %v377_v60 }
 0x7ba   :  { %v474_v62 = vpop.f32.mrf.mxu3  ;;  %v560_v63 = vpop.f32.mrf.mxu0 }
 0x7bb   :  { %v564_v2 = vadd.f32 %v560_v63, %v476_v61 }
 0x7bd   :  { %v2585_v3 = vadd.f32 %v564_v2, %v2464_v0  ;;  %v2231_v0 = vld [vmem:[%s3004_s10 + $0x2c] sm:$0xf0] }
 0x7be   :  { %v1950_v1 = vor.u32 %v2231_v0, %v1949_v22 }
 0x7bf   :  { %v566_v4 = vmul.f32 %v2585_v3, %v2585_v3 }
 0x7c0   :  { %703 = vmatpush.bf16.msra.mxu3 %v1950_v1 }
 0x7c1   :  { %v567_v5 = vsel %vm109_vm0, %v566_v4, 0.0 }
 0x7c2   :  { %568 = vadd.xlane.f32.xlu2 %v567_v5  ;;  %v562_v6 = vpop.f32.mrf.mxu0 }
 0x7c4   :  { %704 = vmatpush.bf16.msra.mxu3 %v1934_v20 }
 0x835   :  { %v569_v38 = vpop.xlane.xlu2 %568 }
 0x836   :  { %v570_v39 = vmul.f32 %v569_v38, %v2483_v13 }
 0x838   :  { %v571_v41 = vadd.f32 1e-05, %v570_v39 }
 0x83a   :  { %2311 = vrsqrt.f32 %v571_v41  ;;  %vm578_vm13 = vweird.f32 %v571_v41 }
 0x840   :  { %v2312_v42 = vpop.eup %2311 }
 0x841   :  { %v573_v43 = vmul.f32 %v2312_v42, %v571_v41  ;;  %vm579_vm12 = vweird.f32 %v2312_v42 }
 0x842   :  { %vm580_vm14 = vmor %vm578_vm13, %vm579_vm12 }
 0x843   :  { %v574_v44 = vmul.f32 %v2312_v42, %v573_v43 }
 0x845   :  { %v575_v45 = vmul.f32 0.5, %v574_v44 }
 0x847   :  { %v576_v40 = vsub.f32 1.5, %v575_v45 }
 0x849   :  { %v577_v46 = vmul.f32 %v2312_v42, %v576_v40 }
 0x84b   :  { %v581_v48 = vsel %vm580_vm14, %v2312_v42, %v577_v46 }
 0x84c   :  { %v582_v50 = vmul.f32 %v581_v48, %v2585_v3 }
 0x84e   :  { %v586_v52 = vmul.f32 %v2287_v47, %v582_v50 }
 0x850   :  { %1930 = vmatmul.msk.f32.vlgmr.msra.gmra.mxu1 %vm109_vm0, %v586_v52  ;;  %v587_v53 = vpack.c.bf16 %v586_v52, %v586_v52 }
 0x852   :  { %1963 = vmatmul.msk.bf16.vlgmr.msra.gmra.mxu3 %vm109_vm0, %v587_v53  ;;  %1965 = vmatmul.msk.bf16.vlgmr.msra.gmra.mxu2 %vm109_vm0, %v587_v53 }
 0x853   :  { %1966 = vmatmul.msk.bf16.vlgmr.msrb.gmra.mxu0 %vm109_vm0, %v587_v53 }
 0x858   :  { %1964 = vmatmul.msk.bf16.vlgmr.msrb.gmra.mxu1 %vm109_vm0, %v587_v53  ;;  %v45_v53 = vld [vmem:[%s2997_s3] sm:$0xff] }
 0x859   :  { %792 = vst [vmem:[#allocation1] ss:$2 sm:$0xff] %v45_v53 }
 0x8cd   :  { %v2660_v54 = vpop.f32.mrf.mxu1 }
 0x8ce   :  { %v612_v55 = vsel %vm611_vm15, %v2660_v54, -inf }
 0x8cf   :  { %613 = vmax.xlane.f32.xlu2 %v612_v55  ;;  %v793_v55 = vld.sshfl [vmem:[#allocation1] sm:$0xff pattern:$0x75316420] }
 0x8d0   :  { %v745_v56 = vpop.f32.mrf.mxu0  ;;  %1969 = vmatpush.msk.msrb.mxu3 %vm256_vm5, %v793_v55 }
 0x8d5   :  { %v706_v57 = vpop.f32.mrf.mxu3  ;;  %v719_v58 = vpop.f32.mrf.mxu1 }
 0x8d6   :  { %v1967_v59 = vmul.f32 -1.442695, %v706_v57  ;;  %v1968_v60 = vmul.f32 -1.442695, %v719_v58  ;;  %v732_v61 = vpop.f32.mrf.mxu2 }
 0x8d8   :  { %2313 = vpow2.f32 %v1967_v59  ;;  %v747_v62 = vpop.f32.mrf.mxu0  ;;  %v2239_v59 = vld [vmem:[%s3005_s11 + $0x30] sm:$0xff] }
 0x8d9   :  { %2315 = vpow2.f32 %v1968_v60  ;;  %v2246_v60 = vld [vmem:[%s3005_s11 + $0x68] sm:$0xff]  ;;  %v2245_v62 = vld [vmem:[%s3005_s11 + $0x60] sm:$0xff] }
 0x8dd   :  { %v708_v63 = vpop.f32.mrf.mxu3  ;;  %v721_v2 = vpop.f32.mrf.mxu1 }
 0x8de   :  { %v2314_v4 = vpop.eup %2313  ;;  %v734_v5 = vpop.f32.mrf.mxu2  ;;  %v2237_v63 = vld [vmem:[%s3005_s11 + $0x20] sm:$0xff] }
 0x8df   :  { %v2316_v6 = vpop.eup %2315  ;;  %v755_v7 = vadd.f32 1.0, %v2314_v4  ;;  %v2244_v4 = vld [vmem:[%s3005_s11 + $0x58] sm:$0xff] }
 0x8e0   :  { %v756_v22 = vadd.f32 1.0, %v2316_v6  ;;  %v2236_v5 = vld [vmem:[%s3005_s11 + $0x18] sm:$0xff]  ;;  %v2243_v6 = vld [vmem:[%s3005_s11 + $0x50] sm:$0xff] }
 0x8e1   :  { %2317 = vrcp.f32 %v755_v7  ;;  %v768_v11 = vand.u32 2147483648, %v755_v7  ;;  %v766_v15 = vand.u32 2147483647, %v755_v7  ;;  %vm762_vm3 = vweird.f32 %v755_v7 }
 0x8e2   :  { %2319 = vrcp.f32 %v756_v22  ;;  %v783_v16 = vand.u32 2147483648, %v756_v22  ;;  %v781_v18 = vand.u32 2147483647, %v756_v22  ;;  %vm777_vm8 = vweird.f32 %v756_v22 }
 0x8e3   :  { %v769_v20 = vor.u32 1.1754944e-38, %v768_v11  ;;  %vm767_vm9 = vcmp.eq.f32.partialorder %v766_v15, 8.507059e+37 }
 0x8e4   :  { %v784_v24 = vor.u32 1.1754944e-38, %v783_v16  ;;  %vm782_vm11 = vcmp.eq.f32.partialorder %v781_v18, 8.507059e+37  ;;  %v2241_v18 = vld [vmem:[%s3005_s11 + $0x40] sm:$0xff] }
 0x8e7   :  { %v2318_v0 = vpop.eup %2317 }
 0x8e8   :  { %v2320_v1 = vpop.eup %2319  ;;  %v758_v8 = vmul.f32 %v2318_v0, %v755_v7  ;;  %vm763_vm1 = vweird.f32 %v2318_v0 }
 0x8e9   :  { %v773_v9 = vmul.f32 %v2320_v1, %v756_v22  ;;  %vm778_vm2 = vweird.f32 %v2320_v1  ;;  %vm764_vm4 = vmor %vm762_vm3, %vm763_vm1 }
 0x8ea   :  { %v759_v10 = vsub.f32 1.0, %v758_v8  ;;  %vm779_vm10 = vmor %vm777_vm8, %vm778_vm2 }
 0x8eb   :  { %v774_v14 = vsub.f32 1.0, %v773_v9 }
 0x8ec   :  { %v760_v33 = vmul.f32 %v2318_v0, %v759_v10 }
 0x8ed   :  { %v775_v17 = vmul.f32 %v2320_v1, %v774_v14 }
 0x8ee   :  { %v761_v19 = vadd.f32 %v2318_v0, %v760_v33 }
 0x8ef   :  { %v776_v21 = vadd.f32 %v2320_v1, %v775_v17  ;;  %v2235_v17 = vld [vmem:[%s3005_s11 + $0x10] sm:$0xff] }
 0x8f0   :  { %v765_v23 = vsel %vm764_vm4, %v2318_v0, %v761_v19  ;;  %v2234_v19 = vld [vmem:[%s3005_s11 + $0x8] sm:$0xff] }
 0x8f1   :  { %v770_v25 = vsel %vm767_vm9, %v769_v20, %v765_v23  ;;  %v780_v26 = vsel %vm779_vm10, %v2320_v1, %v776_v21  ;;  %v2242_v1 = vld [vmem:[%s3005_s11 + $0x48] sm:$0xff]  ;;  %v2233_v20 = vld [vmem:[%s3005_s11] sm:$0xff] }
 0x8f2   :  { %v787_v27 = vmul.f32 %v770_v25, %v706_v57  ;;  %v785_v29 = vsel %vm782_vm11, %v784_v24, %v780_v26  ;;  %v2240_v57 = vld [vmem:[%s3005_s11 + $0x38] sm:$0xff] }
 0x8f3   :  { %v788_v30 = vmul.f32 %v785_v29, %v719_v58  ;;  %v2247_v58 = vld [vmem:[%s3005_s11 + $0x70] sm:$0xff]  ;;  %1003 = vmatpush.bf16.msrb.mxu2 %v2240_v57 }
 0x8f4   :  { %v2664_v31 = vmul.f32 %v787_v27, %v732_v61  ;;  %v2238_v61 = vld [vmem:[%s3005_s11 + $0x28] sm:$0xff] }
 0x8f5   :  { %v2666_v32 = vmul.f32 %v788_v30, %v745_v56  ;;  %v2248_v56 = vld [vmem:[%s3005_s11 + $0x78] sm:$0xff] }
 0x8f6   :  { %1016 = vmatpush.bf16.msra.mxu0 %v2248_v56 }
 0x8f7   :  { %1004 = vmatpush.bf16.msrb.mxu2 %v2239_v59 }
 0x8fa   :  { %1017 = vmatpush.bf16.msra.mxu0 %v2247_v58 }
 0x8fb   :  { %1005 = vmatpush.bf16.msrb.mxu2 %v2238_v61 }
 0x8fe   :  { %1018 = vmatpush.bf16.msra.mxu0 %v2246_v60 }
 0x8ff   :  { %1006 = vmatpush.bf16.msrb.mxu2 %v2237_v63 }
 0x902   :  { %1019 = vmatpush.bf16.msra.mxu0 %v2245_v62 }
 0x903   :  { %1007 = vmatpush.bf16.msrb.mxu2 %v2236_v5 }
 0x906   :  { %1020 = vmatpush.bf16.msra.mxu0 %v2244_v4 }
 0x907   :  { %1008 = vmatpush.bf16.msrb.mxu2 %v2235_v17 }
 0x90a   :  { %1021 = vmatpush.bf16.msra.mxu0 %v2243_v6 }
 0x90b   :  { %1009 = vmatpush.bf16.msrb.mxu2 %v2234_v19 }
 0x90e   :  { %1022 = vmatpush.bf16.msra.mxu0 %v2242_v1 }
 0x90f   :  { %1010 = vmatpush.bf16.msrb.mxu2 %v2233_v20 }
 0x912   :  { %1023 = vmatpush.bf16.msra.mxu0 %v2241_v18 }
 0x942   :  { %v614_v36 = vpop.xlane.xlu2 %613 }
 0x943   :  { %vm615_vm12 = vcmp.eq.f32.partialorder %v2660_v54, %v614_v36  ;;  %v632_v40 = vsub.f32 %v2660_v54, %v614_v36 }
 0x944   :  { %v616_v38 = vsel %vm615_vm12, %v2669_v35, 4.0 }
 0x945   :  { %v617_v39 = vsel %vm611_vm15, %v616_v38, inf  ;;  %v633_v46 = vmul.f32 1.442695, %v632_v40 }
 0x946   :  { %618 = vmin.xlane.f32.xlu0 %v617_v39 }
 0x947   :  { %2321 = vpow2.f32 %v633_v46 }
 0x94d   :  { %v2322_v48 = vpop.eup %2321 }
 0x9b9   :  { %v619_v41 = vpop.xlane.xlu0 %618 }
 0x9ba   :  { %vm620_vm13 = vcmp.eq.f32.partialorder %v2669_v35, %v619_v41 }
 0x9bb   :  { %v621_v42 = vsel %vm620_vm13, -1e+30, %v2660_v54  ;;  %v794_v54 = vld.sshfl [vmem:[#allocation1 + $0x8] sm:$0xff pattern:$0x75316420] }
 0x9bc   :  { %v622_v43 = vsel %vm611_vm15, %v621_v42, -inf  ;;  %1971 = vmatpush.msk.msra.mxu1 %vm256_vm5, %v794_v54  ;;  %1690 = vst [vmem:[#allocation1] ss:$2 sm:$0xff] %v45_v53 }
 0x9bd   :  { %623 = vmax.xlane.f32.xlu2 %v622_v43  ;;  %v2249_v43 = vld [vmem:[%s3000_s6 + $0x10] sm:$0xff] }
 0xa30   :  { %v624_v49 = vpop.xlane.xlu2 %623 }
 0xa31   :  { %vm625_vm14 = vcmp.eq.f32.partialorder %v621_v42, %v624_v49 }
 0xa32   :  { %v626_v44 = vsel %vm625_vm14, %v2669_v35, 4.0 }
 0xa33   :  { %v627_v45 = vsel %vm611_vm15, %v626_v44, inf }
 0xa34   :  { %628 = vmin.xlane.f32.xlu0 %v627_v45 }
 0xaa7   :  { %v629_v47 = vpop.xlane.xlu0 %628 }
 0xaa8   :  { %vm630_vm1 = vcmp.eq.f32.partialorder %v2669_v35, %v629_v47 }
 0xaa9   :  { %vm631_vm2 = vmor %vm620_vm13, %vm630_vm1 }
 0xaaa   :  { %v635_v50 = vsel %vm631_vm2, %v2322_v48, 0.0 }
 0xaab   :  { %v636_v52 = vsel %vm611_vm15, %v635_v50, 0.0 }
 0xaac   :  { %637 = vadd.xlane.f32.xlu1 %v636_v52  ;;  %v2288_v52 = vld [vmem:[%s2999_s5 + $0x1] ss:$0 sm:$0xff] }
 0xb1f   :  { %v638_v2 = vpop.xlane.xlu1 %637 }
 0xb20   :  { %2323 = vrcp.f32 %v638_v2  ;;  %v650_v8 = vand.u32 2147483648, %v638_v2  ;;  %v648_v10 = vand.u32 2147483647, %v638_v2  ;;  %vm644_vm4 = vweird.f32 %v638_v2 }
 0xb22   :  { %v651_v14 = vor.u32 1.1754944e-38, %v650_v8  ;;  %vm649_vm9 = vcmp.eq.f32.partialorder %v648_v10, 8.507059e+37 }
 0xb26   :  { %v2324_v7 = vpop.eup %2323 }
 0xb27   :  { %v640_v22 = vmul.f32 %v2324_v7, %v638_v2  ;;  %vm645_vm3 = vweird.f32 %v2324_v7 }
 0xb28   :  { %vm646_vm8 = vmor %vm644_vm4, %vm645_vm3 }
 0xb29   :  { %v641_v0 = vsub.f32 1.0, %v640_v22 }
 0xb2b   :  { %v642_v9 = vmul.f32 %v2324_v7, %v641_v0 }
 0xb2d   :  { %v643_v11 = vadd.f32 %v2324_v7, %v642_v9 }
 0xb2f   :  { %v647_v33 = vsel %vm646_vm8, %v2324_v7, %v643_v11 }
 0xb30   :  { %v652_v15 = vsel %vm649_vm9, %v651_v14, %v647_v33 }
 0xb31   :  { %v653_v16 = vmul.f32 %v652_v15, %v635_v50 }
 0xb33   :  { %1970 = vmatmul.msk.f32.vlgmr.msrb.gmra.mxu3 %vm611_vm15, %v653_v16  ;;  %1972 = vmatmul.msk.f32.vlgmr.msra.gmra.mxu1 %vm611_vm15, %v653_v16 }
 0xbb0   :  { %v839_v21 = vpop.f32.mrf.mxu1 }
 0xbb1   :  { %v843_v23 = vmul.f32 %v839_v21, %v2666_v32 }
 0xbb3   :  { %v845_v24 = vpack.c.bf16 %v843_v23, %v843_v23 }
 0xbb5   :  { %1024 = vmatmul.bf16.vlgmr.msra.gmra.mxu0 %v845_v24 }
 0xbb6   :  { %v819_v25 = vpop.f32.mrf.mxu3 }
 0xbb7   :  { %v842_v26 = vmul.f32 %v819_v25, %v2664_v31  ;;  %v2250_v31 = vld [vmem:[%s3000_s6 + $0x18] sm:$0xff] }
 0xbb8   :  { %1072 = vmatpush.bf16.msra.mxu3 %v2250_v31 }
 0xbb9   :  { %v844_v27 = vpack.c.bf16 %v842_v26, %v842_v26  ;;  %v1979_v26 = vld [vmem:[%s3001_s7 + $0x14] sm:$0xf] }
 0xbbb   :  { %1011 = vmatmul.bf16.vlgmr.msrb.gmra.mxu2 %v844_v27  ;;  %v1246_v27 = vsel %vm256_vm5, %v1979_v26, 0 }
 0xbbc   :  { %1073 = vmatpush.bf16.msra.mxu3 %v2249_v43 }
 0xc32   :  { %v1025_v29 = vpop.f32.mrf.mxu0 }
 0xc3a   :  { %v1027_v30 = vpop.f32.mrf.mxu0 }
 0xc3e   :  { %v1012_v36 = vpop.f32.mrf.mxu2 }
 0xc3f   :  { %v1013_v38 = vadd.f32 %v1012_v36, %v2585_v3 }
 0xc41   :  { %v2744_v39 = vadd.f32 %v1025_v29, %v1013_v38 }
 0xc43   :  { %v1029_v41 = vmul.f32 %v2744_v39, %v2744_v39 }
 0xc45   :  { %v1030_v42 = vsel %vm109_vm0, %v1029_v41, 0.0 }
 0xc46   :  { %v1014_v32 = vpop.f32.mrf.mxu2  ;;  %1031 = vadd.xlane.f32.xlu2 %v1030_v42 }
 0xcb9   :  { %v1032_v3 = vpop.xlane.xlu2 %1031 }
 0xcba   :  { %v1033_v49 = vmul.f32 %v1032_v3, %v2483_v13 }
 0xcbc   :  { %v1034_v44 = vadd.f32 1e-05, %v1033_v49 }
 0xcbe   :  { %2325 = vrsqrt.f32 %v1034_v44  ;;  %vm1041_vm11 = vweird.f32 %v1034_v44 }
 0xcc4   :  { %v2326_v45 = vpop.eup %2325 }
 0xcc5   :  { %v1036_v40 = vmul.f32 %v2326_v45, %v1034_v44  ;;  %vm1042_vm10 = vweird.f32 %v2326_v45 }
 0xcc6   :  { %vm1043_vm12 = vmor %vm1041_vm11, %vm1042_vm10 }
 0xcc7   :  { %v1037_v46 = vmul.f32 %v2326_v45, %v1036_v40 }
 0xcc9   :  { %v1038_v47 = vmul.f32 0.5, %v1037_v46 }
 0xccb   :  { %v1039_v48 = vsub.f32 1.5, %v1038_v47 }
 0xccd   :  { %v1040_v50 = vmul.f32 %v2326_v45, %v1039_v48 }
 0xccf   :  { %v1044_v53 = vsel %vm1043_vm12, %v2326_v45, %v1040_v50 }
 0xcd0   :  { %v1045_v55 = vmul.f32 %v1044_v53, %v2744_v39 }
 0xcd2   :  { %v1049_v54 = vmul.f32 %v2288_v52, %v1045_v55 }
 0xcd4   :  { %v1050_v56 = vpack.c.bf16 %v1049_v54, %v1049_v54 }
 0xcd6   :  { %2099 = vmatmul.msk.bf16.vlgmr.msra.gmra.mxu3 %vm109_vm0, %v1050_v56 }
 0xd59   :  { %v1075_v57 = vpop.f32.mrf.mxu3 }
 0xd5a   :  { %v1087_v58 = vmul.f32 %v1075_v57, %v2494_v28  ;;  %v1080_v59 = vmul.f32 %v1075_v57, %v2500_v34  ;;  %v1093_v60 = vpack.c.bf16 %v1075_v57, %v1075_v57  ;;  %v1086_v2 = vmul.f32 %v1075_v57, %v2506_v37 }
 0xd5b   :  { %v1079_v34 = vmul.f32 %v1075_v57, %v2481_v12 }
 0xd5c   :  { %1089 = vrot.lane.b32.xlu0 %v1087_v58, %s2389_s15  ;;  %1082 = vrot.lane.b32.xlu2 %v1080_v59, %s2390_s16  ;;  %v1150_v61 = vunpack.c.l.b16 %v1093_v60 }
 0xd5e   :  { %v2765_v62 = vpack.c.b16 %v1150_v61, %v1150_v61 }
 0xd60   :  { %1152 = vrot.lane.b32.xlu1 %v2765_v62, %s2388_s14 }
 0xd61   :  { %v1077_v63 = vpop.f32.mrf.mxu3 }
 0xd62   :  { %v1978_v63 = vld [vmem:[%s3001_s7 + $0x10] sm:$0xf] }
 0xdb6   :  { %v1083_v28 = vpop.permute.xlu2 %1082 }
 0xdb7   :  { %v1085_v6 = vadd.f32 %v1083_v28, %v1079_v34 }
 0xdce   :  { %v1090_v4 = vpop.permute.xlu0 %1089 }
 0xdcf   :  { %v1092_v5 = vadd.f32 %v1090_v4, %v1086_v2  ;;  %v1265_v2 = vsel %vm256_vm5, %v1978_v63, 0  ;;  %v1981_v63 = vld [vmem:[%s3001_s7 + $0x1c] sm:$0xf] }
 0xdd0   :  { %1274 = vmatpush.bf16.msra.mxu2 %v1265_v2 }
 0xdd1   :  { %1095 = vrot.lane.b32.xlu0 %v1092_v5, %s2387_s13  ;;  %s2395_s13 = smov [#allocation2]  }
 0xdd2   :  { %v1153_v7 = vpop.permute.xlu1 %1152  ;;  %s1894_s14 = sshll.u32 %s2395_s13, 4  ;;  %s1895_s14 = int_to_ptr.vmem [resolvable:$true] %s1894_s14 }
 0xdd3   :  { %v1158_v0 = vsel %vm256_vm5, %v1153_v7, 0 }
 0xdd9   :  { %1174 = vrot.lane.b32.xlu0 %v1085_v6, %s2391_s17  ;;  %s1896_s17 = sshll.u32 %s3006_s12, 4  ;;  %s1897_s17 = int_to_ptr.hbm [resolvable:$true] %s1896_s17 }
 0xe43   :  { %v1096_v22 = vpop.permute.xlu0 %1095 }
 0xe44   :  { %2100 = vmatpush.xpose.msk.msrb.mxu1 %vm195_vm6, %v1096_v22  ;;  %2103 = vmatpush.xpose.msk.msrb.mxu3 %vm195_vm6, %v1096_v22 }
 0xe47   :  { %2101 = vmatmul.msk.f32.vlgmr.msrb.gmra.mxu1 %vm195_vm6, %v1085_v6 }
 0xe48   :  { %1167 = vmatpush.bf16.msra.mxu1 %v1158_v0  ;;  %1235 = vmatpush.bf16.msra.mxu3 %v1158_v0 }
 0xe4b   :  { %v1175_v37 = vpop.permute.xlu0 %1174 }
 0xe4c   :  { %2104 = vmatmul.msk.f32.vlgmr.msrb.gmra.mxu3 %vm195_vm6, %v1175_v37  ;;  %1255 = vmatpush.bf16.msrb.mxu1 %v1246_v27 }
 0xec4   :  { %v1119_v1 = vpop.f32.mrf.mxu1 }
 0xec5   :  { %v1122_v12 = vmul.f32 0.35355338, %v1119_v1 }
 0xec7   :  { %v1123_v8 = vsel %vm2522_vm7, %v1122_v12, -1e+30 }
 0xec8   :  { %v1124_v9 = vsel %vm195_vm6, %v1123_v8, -inf }
 0xec9   :  { %1125 = vmax.xlane.f32.xlu1 %v1124_v9 }
 0xecf   :  { %v1195_v10 = vpop.f32.mrf.mxu3 }
 0xed0   :  { %v1198_v11 = vmul.f32 0.35355338, %v1195_v10 }
 0xed2   :  { %v1199_v14 = vsel %vm2522_vm7, %v1198_v11, -1e+30 }
 0xed3   :  { %v1200_v33 = vsel %vm195_vm6, %v1199_v14, -inf }
 0xed4   :  { %1201 = vmax.xlane.f32.xlu2 %v1200_v33 }
 0xf3c   :  { %v1126_v15 = vpop.xlane.xlu1 %1125 }
 0xf3d   :  { %v1127_v16 = vsub.f32 %v1123_v8, %v1126_v15 }
 0xf3f   :  { %v1128_v17 = vmul.f32 1.442695, %v1127_v16 }
 0xf41   :  { %2327 = vpow2.f32 %v1128_v17 }
 0xf47   :  { %v2328_v18 = vpop.eup %2327  ;;  %v1202_v19 = vpop.xlane.xlu2 %1201 }
 0xf48   :  { %v1203_v20 = vsub.f32 %v1199_v14, %v1202_v19  ;;  %v1130_v21 = vsel %vm195_vm6, %v2328_v18, 0.0 }
 0xf49   :  { %1131 = vadd.xlane.f32.xlu2 %v1130_v21 }
 0xf4a   :  { %v1204_v23 = vmul.f32 1.442695, %v1203_v20 }
 0xf4c   :  { %2329 = vpow2.f32 %v1204_v23 }
 0xf52   :  { %v2330_v24 = vpop.eup %2329 }
 0xf53   :  { %v1206_v25 = vsel %vm195_vm6, %v2330_v24, 0.0 }
 0xf54   :  { %1207 = vadd.xlane.f32.xlu0 %v1206_v25 }
 0xf61   :  { %1280 = vrot.lane.b32.xlu2 %v1085_v6, %s2389_s15 }
 0xf68   :  { %1282 = vrot.lane.b32.xlu0 %v1092_v5, %s2393_s21 }
 0xf70   :  { %1377 = vrot.lane.b32.xlu0 %v1085_v6, %s2392_s20 }
 0xfbc   :  { %v1132_v29 = vpop.xlane.xlu2 %1131 }
 0xfbd   :  { %2331 = vrcp.f32 %v1132_v29  ;;  %v1144_v41 = vand.u32 2147483648, %v1132_v29  ;;  %v1142_v31 = vand.u32 2147483647, %v1132_v29  ;;  %vm1138_vm14 = vweird.f32 %v1132_v29 }
 0xfbf   :  { %v1145_v3 = vor.u32 1.1754944e-38, %v1144_v41  ;;  %vm1143_vm2 = vcmp.eq.f32.partialorder %v1142_v31, 8.507059e+37 }
 0xfc3   :  { %v2332_v30 = vpop.eup %2331 }
 0xfc4   :  { %v1134_v36 = vmul.f32 %v2332_v30, %v1132_v29  ;;  %vm1139_vm13 = vweird.f32 %v2332_v30  ;;  %v1281_v61 = vpop.permute.xlu2 %1280 }
 0xfc5   :  { %vm1140_vm1 = vmor %vm1138_vm14, %vm1139_vm13 }
 0xfc6   :  { %v1135_v38 = vsub.f32 1.0, %v1134_v36 }
 0xfc7   :  { %v1208_v42 = vpop.xlane.xlu0 %1207 }
 0xfc8   :  { %v1136_v32 = vmul.f32 %v2332_v30, %v1135_v38  ;;  %2333 = vrcp.f32 %v1208_v42  ;;  %v1220_v50 = vand.u32 2147483648, %v1208_v42  ;;  %v1218_v53 = vand.u32 2147483647, %v1208_v42 }
 0xfc9   :  { %vm1214_vm4 = vweird.f32 %v1208_v42 }
 0xfca   :  { %v1137_v43 = vadd.f32 %v2332_v30, %v1136_v32  ;;  %v1221_v54 = vor.u32 1.1754944e-38, %v1220_v50  ;;  %vm1219_vm9 = vcmp.eq.f32.partialorder %v1218_v53, 8.507059e+37 }
 0xfcc   :  { %v1141_v49 = vsel %vm1140_vm1, %v2332_v30, %v1137_v43 }
 0xfcd   :  { %v1146_v44 = vsel %vm1143_vm2, %v1145_v3, %v1141_v49 }
 0xfce   :  { %v2334_v45 = vpop.eup %2333  ;;  %v1147_v40 = vmul.f32 %v2328_v18, %v1146_v44 }
 0xfcf   :  { %v1210_v46 = vmul.f32 %v2334_v45, %v1208_v42  ;;  %vm1215_vm3 = vweird.f32 %v2334_v45 }
 0xfd0   :  { %v1148_v47 = vpack.c.bf16 %v1147_v40, %v1147_v40  ;;  %vm1216_vm8 = vmor %vm1214_vm4, %vm1215_vm3 }
 0xfd1   :  { %v1211_v48 = vsub.f32 1.0, %v1210_v46 }
 0xfd2   :  { %2102 = vmatmul.msk.bf16.vlgmr.msra.gmra.mxu1 %vm195_vm6, %v1148_v47 }
 0xfd3   :  { %v1212_v52 = vmul.f32 %v2334_v45, %v1211_v48 }
 0xfd5   :  { %v1213_v55 = vadd.f32 %v2334_v45, %v1212_v52 }
 0xfd7   :  { %v1217_v56 = vsel %vm1216_vm8, %v2334_v45, %v1213_v55 }
 0xfd8   :  { %v1222_v57 = vsel %vm1219_vm9, %v1221_v54, %v1217_v56 }
 0xfd9   :  { %v1223_v58 = vmul.f32 %v2330_v24, %v1222_v57 }
 0xfda   :  { %v1283_v59 = vpop.permute.xlu0 %1282 }
 0xfdb   :  { %2108 = vmatpush.xpose.msk.msrb.mxu0 %vm195_vm6, %v1283_v59  ;;  %2112 = vmatpush.xpose.msk.msra.mxu1 %vm195_vm6, %v1283_v59  ;;  %v1224_v60 = vpack.c.bf16 %v1223_v58, %v1223_v58 }
 0xfdd   :  { %2105 = vmatmul.msk.bf16.vlgmr.msra.gmra.mxu3 %vm195_vm6, %v1224_v60 }
 0xfde   :  { %2109 = vmatmul.msk.f32.vlgmr.msrb.gmra.mxu0 %vm195_vm6, %v1281_v61  ;;  %v1980_v61 = vld [vmem:[%s3001_s7 + $0x18] sm:$0xf] }
 0xfdf   :  { %v1361_v2 = vsel %vm256_vm5, %v1980_v61, 0 }
 0xfe0   :  { %1370 = vmatpush.bf16.msra.mxu0 %v1361_v2 }
 0xfe2   :  { %v1378_v12 = vpop.permute.xlu0 %1377 }
0x104f   :  { %v1169_v4 = vpop.f32.mrf.mxu1 }
0x1050   :  { %v1173_v5 = vpack.c.bf16 %v1169_v4, %v1169_v4  ;;  %v1449_v4 = vsel %vm256_vm5, %v1981_v63, 0 }
0x1052   :  { %2107 = vmatmul.msk.bf16.vlgmr.msra.gmra.mxu2 %vm195_vm6, %v1173_v5 }
0x1057   :  { %v1171_v28 = vpop.f32.mrf.mxu1 }
0x105b   :  { %v1305_v34 = vpop.f32.mrf.mxu0 }
0x105c   :  { %v1308_v6 = vmul.f32 0.35355338, %v1305_v34 }
0x105e   :  { %v1309_v7 = vsel %vm2522_vm7, %v1308_v6, -1e+30 }
0x105f   :  { %v1310_v22 = vsel %vm195_vm6, %v1309_v7, -inf }
0x1060   :  { %v1237_v0 = vpop.f32.mrf.mxu3  ;;  %1311 = vmax.xlane.f32.xlu1 %v1310_v22 }
0x1061   :  { %v1241_v37 = vpack.c.bf16 %v1237_v0, %v1237_v0 }
0x1063   :  { %2106 = vmatmul.msk.bf16.vlgmr.msrb.gmra.mxu1 %vm195_vm6, %v1241_v37 }
0x1064   :  { %1458 = vmatpush.bf16.msrb.mxu1 %v1449_v4 }
0x1068   :  { %v1239_v1 = vpop.f32.mrf.mxu3 }
0x1073   :  { %2113 = vmatmul.msk.f32.vlgmr.msra.gmra.mxu1 %vm195_vm6, %v1378_v12 }
0x10d3   :  { %v1312_v8 = vpop.xlane.xlu1 %1311 }
0x10d4   :  { %v1313_v9 = vsub.f32 %v1309_v7, %v1312_v8 }
0x10d5   :  { %v1276_v10 = vpop.f32.mrf.mxu2 }
0x10d6   :  { %v1314_v11 = vmul.f32 1.442695, %v1313_v9 }
0x10d8   :  { %2335 = vpow2.f32 %v1314_v11 }
0x10dd   :  { %v1278_v14 = vpop.f32.mrf.mxu2 }
0x10de   :  { %v2336_v33 = vpop.eup %2335 }
0x10df   :  { %v1316_v15 = vsel %vm195_vm6, %v2336_v33, 0.0 }
0x10e0   :  { %v1257_v16 = vpop.f32.mrf.mxu1  ;;  %1317 = vadd.xlane.f32.xlu0 %v1316_v15  ;;  %v2135_v15 = vld [vmem:[%s3004_s10 + $0x60] sm:$0xf] }
0x10e1   :  { %v2809_v17 = vadd.f32 %v1276_v10, %v1257_v16 }
0x10e8   :  { %v1259_v18 = vpop.f32.mrf.mxu1 }
0x10e9   :  { %v2137_v18 = vld [vmem:[%s3004_s10 + $0x70] sm:$0xf0] }
0x10f0   :  { %v1398_v19 = vpop.f32.mrf.mxu1 }
0x10f1   :  { %v1401_v20 = vmul.f32 0.35355338, %v1398_v19  ;;  %v2256_v19 = vld [vmem:[%s3004_s10 + $0x6c] sm:$0xf] }
0x10f3   :  { %v1402_v21 = vsel %vm2522_vm7, %v1401_v20, -1e+30  ;;  %v1985_v20 = vld [vmem:[%s3003_s9 + $0x30] sm:$0xff] }
0x10f4   :  { %v1403_v23 = vsel %vm195_vm6, %v1402_v21, -inf }
0x10f5   :  { %1404 = vmax.xlane.f32.xlu2 %v1403_v23  ;;  %v2145_v23 = vld [vmem:[%s3004_s10 + $0x78] sm:$0xf0] }
0x1153   :  { %v1318_v30 = vpop.xlane.xlu0 %1317 }
0x1154   :  { %vm1324_vm11 = vweird.f32 %v1318_v30  ;;  %v1330_v44 = vand.u32 2147483648, %v1318_v30 }
0x1156   :  { %v1331_v50 = vor.u32 1.1754944e-38, %v1330_v44  ;;  %v2254_v44 = vld [vmem:[%s3004_s10 + $0x54] sm:$0xf0] }
0x1168   :  { %v1405_v24 = vpop.xlane.xlu2 %1404 }
0x1169   :  { %v1406_v25 = vsub.f32 %v1402_v21, %v1405_v24  ;;  %v2148_v24 = vor.u32 %v2256_v19, %v2145_v23 }
0x116b   :  { %v1407_v26 = vmul.f32 1.442695, %v1406_v25  ;;  %v1984_v25 = vld [vmem:[%s3003_s9 + $0x28] sm:$0xff]  ;;  %1641 = vmatpush.bf16.msra.mxu1 %v2148_v24 }
0x116d   :  { %2337 = vpow2.f32 %v1407_v26  ;;  %v2119_v26 = vld [vmem:[%s3004_s10 + $0x40] sm:$0xf] }
0x116e   :  { %2339 = vrcp.f32 %v1318_v30 }
0x1173   :  { %v2338_v27 = vpop.eup %2337 }
0x1174   :  { %v1409_v29 = vsel %vm195_vm6, %v2338_v27, 0.0  ;;  %v2340_v36 = vpop.eup %2339 }
0x1175   :  { %1410 = vadd.xlane.f32.xlu1 %v1409_v29  ;;  %v1320_v51 = vmul.f32 %v2340_v36, %v1318_v30  ;;  %vm1325_vm7 = vweird.f32 %v2340_v36  ;;  %v1983_v29 = vld [vmem:[%s3003_s9 + $0x20] sm:$0xff] }
0x1176   :  { %vm1326_vm12 = vmor %vm1324_vm11, %vm1325_vm7 }
0x1177   :  { %v1321_v41 = vsub.f32 1.0, %v1320_v51 }
0x1179   :  { %v1322_v31 = vmul.f32 %v2340_v36, %v1321_v41  ;;  %v2252_v41 = vld [vmem:[%s3004_s10 + $0x4c] sm:$0xf] }
0x117b   :  { %v1323_v49 = vadd.f32 %v2340_v36, %v1322_v31 }
0x117d   :  { %v1327_v47 = vsel %vm1326_vm12, %v2340_v36, %v1323_v49  ;;  %v2251_v36 = vld [vmem:[%s3004_s10 + $0x44] sm:$0xf]  ;;  %v2127_v49 = vld [vmem:[%s3004_s10 + $0x48] sm:$0xf] }
0x118e   :  { %1335 = vrot.lane.b32.xlu1 %v2765_v62, %s2394_s24  ;;  %v1328_v62 = vand.u32 2147483647, %v1318_v30 }
0x1190   :  { %vm1329_vm1 = vcmp.eq.f32.partialorder %v1328_v62, 8.507059e+37 }
0x1191   :  { %v1332_v53 = vsel %vm1329_vm1, %v1331_v50, %v1327_v47 }
0x1192   :  { %v1333_v54 = vmul.f32 %v2336_v33, %v1332_v53  ;;  %v1986_v33 = vld [vmem:[%s3003_s9 + $0x38] sm:$0xff] }
0x1194   :  { %v1334_v59 = vpack.c.bf16 %v1333_v54, %v1333_v54  ;;  %v2289_v54 = vld [vmem:[%s3002_s8 + $0x1] ss:$0 sm:$0xff] }
0x11e8   :  { %v1411_v38 = vpop.xlane.xlu1 %1410 }
0x11e9   :  { %2341 = vrcp.f32 %v1411_v38  ;;  %v1423_v40 = vand.u32 2147483648, %v1411_v38  ;;  %vm1417_vm13 = vweird.f32 %v1411_v38  ;;  %v1421_v46 = vand.u32 2147483647, %v1411_v38 }
0x11eb   :  { %v1424_v52 = vor.u32 1.1754944e-38, %v1423_v40  ;;  %vm1422_vm2 = vcmp.eq.f32.partialorder %v1421_v46, 8.507059e+37 }
0x11ef   :  { %v2342_v42 = vpop.eup %2341 }
0x11f0   :  { %v1413_v32 = vmul.f32 %v2342_v42, %v1411_v38  ;;  %vm1418_vm10 = vweird.f32 %v2342_v42  ;;  %v2121_v38 = vld [vmem:[%s3004_s10 + $0x50] sm:$0xf0] }
0x11f1   :  { %vm1419_vm14 = vmor %vm1417_vm13, %vm1418_vm10  ;;  %v2124_v51 = vor.u32 %v2251_v36, %v2121_v38 }
0x11f2   :  { %v1414_v43 = vsub.f32 1.0, %v1413_v32  ;;  %v2143_v32 = vld [vmem:[%s3004_s10 + $0x68] sm:$0xf] }
0x11f4   :  { %v1415_v3 = vmul.f32 %v2342_v42, %v1414_v43  ;;  %v2258_v43 = vld [vmem:[%s3004_s10 + $0x74] sm:$0xf0] }
0x11f6   :  { %v1416_v45 = vadd.f32 %v2342_v42, %v1415_v3  ;;  %v2144_v3 = vor.u32 %v2258_v43, %v2143_v32 }
0x11f8   :  { %v1420_v48 = vsel %vm1419_vm14, %v2342_v42, %v1416_v45  ;;  %v2129_v42 = vld [vmem:[%s3004_s10 + $0x58] sm:$0xf0]  ;;  %v2128_v45 = vor.u32 %v2254_v44, %v2127_v49 }
0x11f9   :  { %v1425_v55 = vsel %vm1422_vm2, %v1424_v52, %v1420_v48  ;;  %v2132_v31 = vor.u32 %v2252_v41, %v2129_v42 }
0x11fa   :  { %v1426_v56 = vmul.f32 %v2338_v27, %v1425_v55  ;;  %v2253_v27 = vld [vmem:[%s3004_s10 + $0x4c] sm:$0xf0] }
0x11fb   :  { %v2120_v30 = vor.u32 %v2253_v27, %v2119_v26  ;;  %1642 = vmatpush.bf16.msra.mxu1 %v2132_v31 }
0x11fc   :  { %v1427_v60 = vpack.c.bf16 %v1426_v56, %v1426_v56 }
0x1200   :  { %v1336_v57 = vpop.permute.xlu1 %1335 }
0x1201   :  { %v1341_v58 = vsel %vm256_vm5, %v1336_v57, 0 }
0x1202   :  { %1350 = vmatpush.bf16.msrb.mxu3 %v1341_v58  ;;  %1438 = vmatpush.bf16.msrb.mxu2 %v1341_v58 }
0x1205   :  { %2110 = vmatmul.msk.bf16.vlgmr.msrb.gmra.mxu3 %vm195_vm6, %v1334_v59  ;;  %2114 = vmatmul.msk.bf16.vlgmr.msrb.gmra.mxu2 %vm195_vm6, %v1427_v60 }
0x1206   :  { %1503 = vmatpush.msra.mxu3 %v1986_v33 }
0x1208   :  { %1504 = vmatpush.msra.mxu3 %v1985_v20 }
0x120a   :  { %1505 = vmatpush.msra.mxu3 %v1984_v25 }
0x120c   :  { %1506 = vmatpush.msra.mxu3 %v1983_v29 }
0x120e   :  { %1628 = vmatpush.bf16.msrb.mxu3 %v2144_v3 }
0x1212   :  { %1629 = vmatpush.bf16.msrb.mxu3 %v2128_v45 }
0x1288   :  { %v1352_v5 = vpop.f32.mrf.mxu3  ;;  %v1440_v28 = vpop.f32.mrf.mxu2 }
0x1289   :  { %v1356_v34 = vpack.c.bf16 %v1352_v5, %v1352_v5  ;;  %v1444_v6 = vpack.c.bf16 %v1440_v28, %v1440_v28 }
0x128b   :  { %2111 = vmatmul.msk.bf16.vlgmr.msra.gmra.mxu0 %vm195_vm6, %v1356_v34  ;;  %2115 = vmatmul.msk.bf16.vlgmr.msrb.gmra.mxu1 %vm195_vm6, %v1444_v6 }
0x1290   :  { %v1354_v7 = vpop.f32.mrf.mxu3  ;;  %v1442_v22 = vpop.f32.mrf.mxu2 }
0x1308   :  { %v1372_v0 = vpop.f32.mrf.mxu0  ;;  %v1460_v37 = vpop.f32.mrf.mxu1 }
0x1309   :  { %v1376_v1 = vadd.f32 %v1372_v0, %v2809_v17  ;;  %v2255_v17 = vld [vmem:[%s3004_s10 + $0x64] sm:$0xf] }
0x130a   :  { %v2140_v21 = vor.u32 %v2255_v17, %v2137_v18 }
0x130b   :  { %v1464_v12 = vadd.f32 %v1460_v37, %v1376_v1 }
0x130c   :  { %1615 = vmatpush.bf16.msra.mxu2 %v2140_v21 }
0x130d   :  { %v2832_v8 = vadd.f32 %v1464_v12, %v2744_v39  ;;  %v2257_v39 = vld [vmem:[%s3004_s10 + $0x6c] sm:$0xf0] }
0x130e   :  { %v2136_v16 = vor.u32 %v2257_v39, %v2135_v15 }
0x130f   :  { %v1466_v9 = vmul.f32 %v2832_v8, %v2832_v8 }
0x1310   :  { %v1374_v10 = vpop.f32.mrf.mxu0  ;;  %v1462_v11 = vpop.f32.mrf.mxu1  ;;  %1602 = vmatpush.bf16.msrb.mxu0 %v2136_v16  ;;  %1616 = vmatpush.bf16.msra.mxu2 %v2124_v51 }
0x1311   :  { %v1467_v14 = vsel %vm109_vm0, %v1466_v9, 0.0 }
0x1312   :  { %1468 = vadd.xlane.f32.xlu1 %v1467_v14 }
0x1314   :  { %1603 = vmatpush.bf16.msrb.mxu0 %v2120_v30 }
0x1385   :  { %v1469_v40 = vpop.xlane.xlu1 %1468 }
0x1386   :  { %v1470_v62 = vmul.f32 %v1469_v40, %v2483_v13 }
0x1388   :  { %v1471_v46 = vadd.f32 1e-05, %v1470_v62 }
0x138a   :  { %2343 = vrsqrt.f32 %v1471_v46  ;;  %vm1478_vm3 = vweird.f32 %v1471_v46 }
0x1390   :  { %v2344_v47 = vpop.eup %2343 }
0x1391   :  { %v1473_v48 = vmul.f32 %v2344_v47, %v1471_v46  ;;  %vm1479_vm6 = vweird.f32 %v2344_v47 }
0x1392   :  { %vm1480_vm4 = vmor %vm1478_vm3, %vm1479_vm6 }
0x1393   :  { %v1474_v50 = vmul.f32 %v2344_v47, %v1473_v48 }
0x1395   :  { %v1475_v52 = vmul.f32 0.5, %v1474_v50 }
0x1397   :  { %v1476_v53 = vsub.f32 1.5, %v1475_v52 }
0x1399   :  { %v1477_v55 = vmul.f32 %v2344_v47, %v1476_v53 }
0x139b   :  { %v1481_v56 = vsel %vm1480_vm4, %v2344_v47, %v1477_v55  ;;  %v1691_v55 = vld.sshfl [vmem:[#allocation1] sm:$0xff pattern:$0x75316420] }
0x139c   :  { %v1482_v57 = vmul.f32 %v1481_v56, %v2832_v8  ;;  %2155 = vmatpush.msk.msra.mxu0 %vm256_vm5, %v1691_v55  ;;  %v2266_v56 = vld [vmem:[%s3005_s11 + $0xb8] sm:$0xff] }
0x139e   :  { %v1486_v58 = vmul.f32 %v2289_v54, %v1482_v57  ;;  %v1692_v54 = vld.sshfl [vmem:[#allocation1 + $0x8] sm:$0xff pattern:$0x75316420]  ;;  %v2274_v57 = vld [vmem:[%s3005_s11 + $0xf8] sm:$0xff] }
0x139f   :  { %2157 = vmatpush.msk.msrb.mxu2 %vm256_vm5, %v1692_v54  ;;  %1853 = vmatpush.bf16.msrb.mxu1 %v2274_v57 }
0x13a0   :  { %2116 = vmatmul.msk.f32.vlgmr.msra.gmra.mxu3 %vm109_vm0, %v1486_v58  ;;  %v1487_v59 = vpack.c.bf16 %v1486_v58, %v1486_v58  ;;  %v2273_v58 = vld [vmem:[%s3005_s11 + $0xf0] sm:$0xff] }
0x13a1   :  { %1840 = vmatpush.bf16.msra.mxu3 %v2266_v56 }
0x13a2   :  { %2149 = vmatmul.msk.bf16.vlgmr.msrb.gmra.mxu0 %vm109_vm0, %v1487_v59  ;;  %2150 = vmatmul.msk.bf16.vlgmr.msra.gmra.mxu2 %vm109_vm0, %v1487_v59 }
0x13a3   :  { %2152 = vmatmul.msk.bf16.vlgmr.msra.gmra.mxu1 %vm109_vm0, %v1487_v59 }
0x13a4   :  { %1854 = vmatpush.bf16.msrb.mxu1 %v2273_v58 }
0x13a8   :  { %2151 = vmatmul.msk.bf16.vlgmr.msrb.gmra.mxu3 %vm109_vm0, %v1487_v59  ;;  %v2264_v59 = vld [vmem:[%s3005_s11 + $0xa8] sm:$0xff] }
0x141f   :  { %v1605_v60 = vpop.f32.mrf.mxu0 }
0x1420   :  { %v2153_v61 = vmul.f32 -1.442695, %v1605_v60  ;;  %v1644_v63 = vpop.f32.mrf.mxu1 }
0x1422   :  { %2345 = vpow2.f32 %v2153_v61  ;;  %v2263_v61 = vld [vmem:[%s3005_s11 + $0xa0] sm:$0xff] }
0x1423   :  { %v2907_v2 = vpop.f32.mrf.mxu3 }
0x1424   :  { %v1511_v4 = vsel %vm611_vm15, %v2907_v2, -inf }
0x1425   :  { %v1618_v5 = vpop.f32.mrf.mxu2  ;;  %1512 = vmax.xlane.f32.xlu2 %v1511_v4  ;;  %v2262_v4 = vld [vmem:[%s3005_s11 + $0x98] sm:$0xff] }
0x1426   :  { %v2154_v28 = vmul.f32 -1.442695, %v1618_v5 }
0x1427   :  { %v1607_v34 = vpop.f32.mrf.mxu0 }
0x1428   :  { %v2346_v6 = vpop.eup %2345  ;;  %2347 = vpow2.f32 %v2154_v28  ;;  %v1646_v7 = vpop.f32.mrf.mxu1  ;;  %v2261_v28 = vld [vmem:[%s3005_s11 + $0x90] sm:$0xff] }
0x1429   :  { %v1654_v22 = vadd.f32 1.0, %v2346_v6 }
0x142b   :  { %2349 = vrcp.f32 %v1654_v22  ;;  %v1631_v0 = vpop.f32.mrf.mxu3  ;;  %v1667_v33 = vand.u32 2147483648, %v1654_v22  ;;  %v1665_v39 = vand.u32 2147483647, %v1654_v22  ;;  %vm1661_vm9 = vweird.f32 %v1654_v22 }
0x142d   :  { %v1620_v37 = vpop.f32.mrf.mxu2  ;;  %v1668_v19 = vor.u32 1.1754944e-38, %v1667_v33  ;;  %vm1666_vm10 = vcmp.eq.f32.partialorder %v1665_v39, 8.507059e+37  ;;  %v2269_v33 = vld [vmem:[%s3005_s11 + $0xd0] sm:$0xff]  ;;  %v2268_v39 = vld [vmem:[%s3005_s11 + $0xc8] sm:$0xff] }
0x142e   :  { %v2348_v1 = vpop.eup %2347 }
0x142f   :  { %v1655_v12 = vadd.f32 1.0, %v2348_v1 }
0x1431   :  { %v2350_v9 = vpop.eup %2349  ;;  %2351 = vrcp.f32 %v1655_v12  ;;  %v1682_v24 = vand.u32 2147483648, %v1655_v12  ;;  %v1680_v27 = vand.u32 2147483647, %v1655_v12  ;;  %vm1676_vm12 = vweird.f32 %v1655_v12 }
0x1432   :  { %v1657_v10 = vmul.f32 %v2350_v9, %v1654_v22  ;;  %vm1662_vm8 = vweird.f32 %v2350_v9  ;;  %v2260_v22 = vld [vmem:[%s3005_s11 + $0x88] sm:$0xff] }
0x1433   :  { %v1633_v11 = vpop.f32.mrf.mxu3  ;;  %vm1663_vm7 = vmor %vm1661_vm9, %vm1662_vm8  ;;  %v1683_v36 = vor.u32 1.1754944e-38, %v1682_v24  ;;  %vm1681_vm14 = vcmp.eq.f32.partialorder %v1680_v27, 8.507059e+37 }
0x1434   :  { %v1658_v14 = vsub.f32 1.0, %v1657_v10 }
0x1436   :  { %v1659_v15 = vmul.f32 %v2350_v9, %v1658_v14 }
0x1437   :  { %v2352_v16 = vpop.eup %2351 }
0x1438   :  { %v1660_v17 = vadd.f32 %v2350_v9, %v1659_v15  ;;  %v1672_v18 = vmul.f32 %v2352_v16, %v1655_v12  ;;  %vm1677_vm11 = vweird.f32 %v2352_v16  ;;  %v2259_v15 = vld [vmem:[%s3005_s11 + $0x80] sm:$0xff] }
0x1439   :  { %vm1678_vm13 = vmor %vm1676_vm12, %vm1677_vm11 }
0x143a   :  { %v1664_v20 = vsel %vm1663_vm7, %v2350_v9, %v1660_v17  ;;  %v1673_v21 = vsub.f32 1.0, %v1672_v18 }
0x143b   :  { %v1669_v23 = vsel %vm1666_vm10, %v1668_v19, %v1664_v20 }
0x143c   :  { %v1686_v25 = vmul.f32 %v1669_v23, %v1605_v60  ;;  %v1674_v26 = vmul.f32 %v2352_v16, %v1673_v21  ;;  %v2272_v60 = vld [vmem:[%s3005_s11 + $0xe8] sm:$0xff] }
0x143d   :  { %1855 = vmatpush.bf16.msrb.mxu1 %v2272_v60 }
0x143e   :  { %v1675_v29 = vadd.f32 %v2352_v16, %v1674_v26  ;;  %v2911_v30 = vmul.f32 %v1686_v25, %v1631_v0 }
0x1440   :  { %v1679_v38 = vsel %vm1678_vm13, %v2352_v16, %v1675_v29  ;;  %v2267_v16 = vld [vmem:[%s3005_s11 + $0xc0] sm:$0xff] }
0x1441   :  { %v1684_v51 = vsel %vm1681_vm14, %v1683_v36, %v1679_v38 }
0x1442   :  { %v1687_v41 = vmul.f32 %v1684_v51, %v1618_v5  ;;  %v2270_v5 = vld [vmem:[%s3005_s11 + $0xd8] sm:$0xff] }
0x1444   :  { %v2913_v42 = vmul.f32 %v1687_v41, %v1644_v63  ;;  %v2271_v63 = vld [vmem:[%s3005_s11 + $0xe0] sm:$0xff] }
0x1445   :  { %1856 = vmatpush.bf16.msrb.mxu1 %v2271_v63 }
0x1449   :  { %1857 = vmatpush.bf16.msrb.mxu1 %v2270_v5 }
0x144d   :  { %1858 = vmatpush.bf16.msrb.mxu1 %v2269_v33 }
0x1451   :  { %1859 = vmatpush.bf16.msrb.mxu1 %v2268_v39 }
0x1455   :  { %1860 = vmatpush.bf16.msrb.mxu1 %v2267_v16 }
0x1498   :  { %v1513_v32 = vpop.xlane.xlu2 %1512 }
0x1499   :  { %vm1514_vm1 = vcmp.eq.f32.partialorder %v2907_v2, %v1513_v32  ;;  %v1531_v46 = vsub.f32 %v2907_v2, %v1513_v32 }
0x149a   :  { %v1515_v31 = vsel %vm1514_vm1, %v2669_v35, 4.0 }
0x149b   :  { %v1516_v43 = vsel %vm611_vm15, %v1515_v31, inf  ;;  %v1532_v47 = vmul.f32 1.442695, %v1531_v46 }
0x149c   :  { %1517 = vmin.xlane.f32.xlu0 %v1516_v43 }
0x149d   :  { %2353 = vpow2.f32 %v1532_v47 }
0x14a3   :  { %v2354_v50 = vpop.eup %2353 }
0x150f   :  { %v1518_v3 = vpop.xlane.xlu0 %1517 }
0x1510   :  { %vm1519_vm2 = vcmp.eq.f32.partialorder %v2669_v35, %v1518_v3 }
0x1511   :  { %v1520_v49 = vsel %vm1519_vm2, -1e+30, %v2907_v2 }
0x1512   :  { %v1521_v44 = vsel %vm611_vm15, %v1520_v49, -inf }
0x1513   :  { %1522 = vmax.xlane.f32.xlu2 %v1521_v44 }
0x1586   :  { %v1523_v45 = vpop.xlane.xlu2 %1522 }
0x1587   :  { %vm1524_vm6 = vcmp.eq.f32.partialorder %v1520_v49, %v1523_v45 }
0x1588   :  { %v1525_v40 = vsel %vm1524_vm6, %v2669_v35, 4.0 }
0x1589   :  { %v1526_v62 = vsel %vm611_vm15, %v1525_v40, inf }
0x158a   :  { %1527 = vmin.xlane.f32.xlu0 %v1526_v62 }
0x15fd   :  { %v1528_v48 = vpop.xlane.xlu0 %1527 }
0x15fe   :  { %vm1529_vm3 = vcmp.eq.f32.partialorder %v2669_v35, %v1528_v48  ;;  %v2265_v35 = vld [vmem:[%s3005_s11 + $0xb0] sm:$0xff] }
0x15ff   :  { %vm1530_vm4 = vmor %vm1519_vm2, %vm1529_vm3  ;;  %1841 = vmatpush.bf16.msra.mxu3 %v2265_v35 }
0x1600   :  { %v1534_v52 = vsel %vm1530_vm4, %v2354_v50, 0.0 }
0x1601   :  { %v1535_v53 = vsel %vm611_vm15, %v1534_v52, 0.0 }
0x1602   :  { %1536 = vadd.xlane.f32.xlu2 %v1535_v53 }
0x1603   :  { %1842 = vmatpush.bf16.msra.mxu3 %v2264_v59 }
0x1607   :  { %1843 = vmatpush.bf16.msra.mxu3 %v2263_v61 }
0x160b   :  { %1844 = vmatpush.bf16.msra.mxu3 %v2262_v4 }
0x160f   :  { %1845 = vmatpush.bf16.msra.mxu3 %v2261_v28 }
0x1613   :  { %1846 = vmatpush.bf16.msra.mxu3 %v2260_v22 }
0x1617   :  { %1847 = vmatpush.bf16.msra.mxu3 %v2259_v15 }
0x1675   :  { %v1537_v2 = vpop.xlane.xlu2 %1536 }
0x1676   :  { %2355 = vrcp.f32 %v1537_v2  ;;  %v1549_v0 = vand.u32 2147483648, %v1537_v2  ;;  %v1547_v1 = vand.u32 2147483647, %v1537_v2  ;;  %vm1543_vm8 = vweird.f32 %v1537_v2 }
0x1678   :  { %v1550_v9 = vor.u32 1.1754944e-38, %v1549_v0  ;;  %vm1548_vm7 = vcmp.eq.f32.partialorder %v1547_v1, 8.507059e+37 }
0x167c   :  { %v2356_v34 = vpop.eup %2355 }
0x167d   :  { %v1539_v6 = vmul.f32 %v2356_v34, %v1537_v2  ;;  %vm1544_vm5 = vweird.f32 %v2356_v34 }
0x167e   :  { %vm1545_vm9 = vmor %vm1543_vm8, %vm1544_vm5 }
0x167f   :  { %v1540_v7 = vsub.f32 1.0, %v1539_v6 }
0x1681   :  { %v1541_v37 = vmul.f32 %v2356_v34, %v1540_v7 }
0x1683   :  { %v1542_v12 = vadd.f32 %v2356_v34, %v1541_v37 }
0x1685   :  { %v1546_v10 = vsel %vm1545_vm9, %v2356_v34, %v1542_v12 }
0x1686   :  { %v1551_v11 = vsel %vm1548_vm7, %v1550_v9, %v1546_v10 }
0x1687   :  { %v1552_v14 = vmul.f32 %v1551_v11, %v1534_v52 }
0x1689   :  { %2156 = vmatmul.msk.f32.vlgmr.msra.gmra.mxu0 %vm611_vm15, %v1552_v14  ;;  %2158 = vmatmul.msk.f32.vlgmr.msrb.gmra.mxu2 %vm611_vm15, %v1552_v14 }
0x1706   :  { %v1717_v17 = vpop.f32.mrf.mxu0 }
0x1707   :  { %v1740_v18 = vmul.f32 %v1717_v17, %v2911_v30 }
0x1709   :  { %v1742_v19 = vpack.c.bf16 %v1740_v18, %v1740_v18 }
0x170b   :  { %1848 = vmatmul.bf16.vlgmr.msra.gmra.mxu3 %v1742_v19 }
0x170c   :  { %v1737_v20 = vpop.f32.mrf.mxu2 }
0x170d   :  { %v1741_v21 = vmul.f32 %v1737_v20, %v2913_v42 }
0x170f   :  { %v1743_v23 = vpack.c.bf16 %v1741_v21, %v1741_v21 }
0x1711   :  { %1861 = vmatmul.bf16.vlgmr.msrb.gmra.mxu1 %v1743_v23 }
0x178e   :  { %v1849_v24 = vpop.f32.mrf.mxu3  ;;  %v1862_v25 = vpop.f32.mrf.mxu1 }
0x178f   :  { %v1850_v26 = vadd.f32 %v1849_v24, %v2832_v8  ;;  %v2290_v8 = vld [vmem:[%s2998_s4] ss:$0 sm:$0xff] }
0x1791   :  { %v1863_v27 = vadd.f32 %v1862_v25, %v1850_v26 }
0x1793   :  { %v1867_v29 = vmul.f32 %v1863_v27, %v1863_v27 }
0x1795   :  { %v1868_v36 = vsel %vm109_vm0, %v1867_v29, 0.0 }
0x1796   :  { %v1851_v38 = vpop.f32.mrf.mxu3  ;;  %v1864_v51 = vpop.f32.mrf.mxu1  ;;  %1869 = vadd.xlane.f32.xlu0 %v1868_v36 }
0x1809   :  { %v1870_v41 = vpop.xlane.xlu0 %1869 }
0x180a   :  { %v1871_v30 = vmul.f32 %v1870_v41, %v2483_v13 }
0x180c   :  { %v1872_v32 = vadd.f32 1e-05, %v1871_v30 }
0x180e   :  { %2357 = vrsqrt.f32 %v1872_v32  ;;  %vm1879_vm10 = vweird.f32 %v1872_v32 }
0x1814   :  { %v2358_v31 = vpop.eup %2357 }
0x1815   :  { %v1874_v42 = vmul.f32 %v2358_v31, %v1872_v32  ;;  %vm1880_vm15 = vweird.f32 %v2358_v31 }
0x1816   :  { %vm1881_vm11 = vmor %vm1879_vm10, %vm1880_vm15 }
0x1817   :  { %v1875_v43 = vmul.f32 %v2358_v31, %v1874_v42 }
0x1819   :  { %v1876_v3 = vmul.f32 0.5, %v1875_v43 }
0x181b   :  { %v1877_v49 = vsub.f32 1.5, %v1876_v3 }
0x181d   :  { %v1878_v44 = vmul.f32 %v2358_v31, %v1877_v49 }
0x181f   :  { %v1882_v45 = vsel %vm1881_vm11, %v2358_v31, %v1878_v44 }
0x1820   :  { %v1883_v13 = vmul.f32 %v1882_v45, %v1863_v27 }
0x1822   :  { %v1887_v40 = vmul.f32 %v2290_v8, %v1883_v13 }
0x1824   :  { %1888 = vst.msk [vmem:[#allocation2] sm:$0xff] %vm109_vm0, %v1887_v40 }
0x1825   :  { %1899 = dma.vmem_to_hbm [thread:$0]  %s1895_s14, 128, %s1897_s17, [#allocation3]  }
0x1826   :  { %2383 = dma.done.wait [#allocation3], 128  }
0x1827   :  { %2384 = vsyncadd [#allocation3], 4294967168 }
0x1828   :  { %1904 = vsyncpa [#allocation3], 1 }

</bundles_post_ra>
